<compile_context>
chip_gen: v7x
topology: tpu7x:2x2x1
jax: 0.10.0
libtpu: 0.0.40
codegen_flags: <defaults>
</compile_context>

<pallas_src>
import functools
import jax
import jax.numpy as jnp
from jax.experimental import pallas as pl
from jax.experimental.pallas import tpu as pltpu


# ----------------------------------------------------------------------------
# Fused whole-model kernel: all LSTM layers + final FC in one pallas_call.
# Gate order follows PyTorch: [i, f, g, o].
# ----------------------------------------------------------------------------
def make_model_kernel(num_layers, T, B, H):
    compute_dtype = jnp.bfloat16

    def kernel(*refs):
        # refs = (x_ref, [w_ih, w_hh, b] * num_layers, fc_w, fc_b, out_ref, seq_ref)
        x_ref = refs[0]
        layer_refs = refs[1:1 + 3 * num_layers]
        fc_w_ref = refs[1 + 3 * num_layers]
        fc_b_ref = refs[2 + 3 * num_layers]
        out_ref = refs[3 + 3 * num_layers]
        seq_ref = refs[4 + 3 * num_layers]        # (T, B, H) f32 inter-layer buffer

        # Batch-first -> time-major once, on the small VMEM-resident tile.
        x_tm = jnp.transpose(x_ref[...], (1, 0, 2))        # (T, B, D)

        h_last = None
        for layer in range(num_layers):
            w_ih = layer_refs[3 * layer][...]               # (K, 4H) bf16
            w_hh = layer_refs[3 * layer + 1][...]           # (H, 4H) bf16
            b = layer_refs[3 * layer + 2][...]              # (1, 4H) f32  (b_ih + b_hh)

            if layer == 0:
                inp2d = x_tm.reshape(T * B, x_tm.shape[-1])     # (T*B, D)
            else:
                inp2d = seq_ref[...].reshape(T * B, H)          # (T*B, H)

            # One big MXU matmul for the input projections of all timesteps,
            # with the bias broadcast folded in once (hoisted out of the loop).
            gx = jnp.dot(inp2d.astype(compute_dtype), w_ih,
                         preferred_element_type=jnp.float32) + b
            gx = gx.reshape(T, B, 4 * H)                        # (T, B, 4H) f32

            h = jnp.zeros((B, H), jnp.float32)
            c = jnp.zeros((B, H), jnp.float32)
            last_layer = layer == num_layers - 1

            # Fully-unrolled recurrence (T is small & static): one matmul/step.
            for t in range(T):
                g = gx[t] + jnp.dot(h.astype(compute_dtype), w_hh,
                                    preferred_element_type=jnp.float32)  # (B, 4H)
                # NOTE: for H that is a multiple of 128 these slices are
                # lane-aligned zero-cost views.
                i_g = jax.nn.sigmoid(g[:, 0 * H:1 * H])
                f_g = jax.nn.sigmoid(g[:, 1 * H:2 * H])
                g_g = jnp.tanh(g[:, 2 * H:3 * H])
                o_g = jax.nn.sigmoid(g[:, 3 * H:4 * H])

                c = f_g * c + i_g * g_g          # cell state kept in f32
                h = o_g * jnp.tanh(c)
                if not last_layer:
                    seq_ref[t] = h               # feed next layer from VMEM
            h_last = h

        # Fused "out[:, -1, :]" selection + Dropout(eval: identity) + Linear.
        # TODO(synk): training-mode dropout (mask + 1/(1-p) scale) not applied.
        out_ref[...] = (jnp.dot(h_last.astype(compute_dtype), fc_w_ref[...],
                                preferred_element_type=jnp.float32)
                        + fc_b_ref[...])

    return kernel


# ----------------------------------------------------------------------------
# Full model forward (mirrors LSTMModel.forward, eval mode)
# ----------------------------------------------------------------------------
def lstm_model_forward(x_btd, params):
    """x_btd: (B, T, D) batch-first, like the PyTorch module. Returns (B, O)."""
    B, T, D = x_btd.shape
    num_layers = len(params["lstm_layers"])
    H = params["lstm_layers"][0][1].shape[0]
    O = params["fc_w"].shape[1]

    # Pad batch to a multiple of 8 (f32 sublane count); LSTM rows are
    # independent so padded rows are simply discarded at the end.
    B_pad = max(8, ((B + 7) // 8) * 8)
    if B_pad != B:
        x_btd = jnp.pad(x_btd, ((0, B_pad - B), (0, 0), (0, 0)))

    flat_params = []
    for (w_ih, w_hh, b) in params["lstm_layers"]:
        flat_params += [w_ih, w_hh, b]
    flat_params += [params["fc_w"], params["fc_b"]]

    vmem_spec = pl.BlockSpec(memory_space=pltpu.MemorySpace.VMEM)
    out = pl.pallas_call(
        make_model_kernel(num_layers, T, B_pad, H),
        out_shape=jax.ShapeDtypeStruct((B_pad, O), jnp.float32),
        in_specs=[vmem_spec] * (1 + len(flat_params)),
        out_specs=vmem_spec,
        scratch_shapes=[pltpu.VMEM((T, B_pad, H), jnp.float32)],  # inter-layer seq
    )(x_btd, *flat_params)
    return out[:B]


# ----------------------------------------------------------------------------
# Deterministic parameter init (PyTorch-style uniform(-1/sqrt(H), 1/sqrt(H))).
# Weights stored pre-transposed for x @ W and cast to bf16 (matmul operands);
# biases (b_ih + b_hh) stay f32.
# ----------------------------------------------------------------------------
def init_params(key, input_dim, hidden_dim, num_layers, output_dim):
    bound = 1.0 / jnp.sqrt(jnp.float32(hidden_dim))
    layers = []
    for layer in range(num_layers):
        d_in = input_dim if layer == 0 else hidden_dim
        key, k1, k2, k3, k4 = jax.random.split(key, 5)
        w_ih = jax.random.uniform(k1, (d_in, 4 * hidden_dim), jnp.float32, -bound, bound)
        w_hh = jax.random.uniform(k2, (hidden_dim, 4 * hidden_dim), jnp.float32, -bound, bound)
        b_ih = jax.random.uniform(k3, (4 * hidden_dim,), jnp.float32, -bound, bound)
        b_hh = jax.random.uniform(k4, (4 * hidden_dim,), jnp.float32, -bound, bound)
        layers.append((w_ih.astype(jnp.bfloat16),
                       w_hh.astype(jnp.bfloat16),
                       (b_ih + b_hh)[None, :]))
    key, k5, k6 = jax.random.split(key, 3)
    fc_w = jax.random.uniform(k5, (hidden_dim, output_dim), jnp.float32, -bound, bound)
    fc_b = jax.random.uniform(k6, (1, output_dim), jnp.float32, -bound, bound)
    return {"lstm_layers": layers,
            "fc_w": fc_w.astype(jnp.bfloat16),
            "fc_b": fc_b}


if __name__ == "__main__":
    # small shapes consistent with the module's forward
    B, T, D = 2, 8, 8          # batch, seq, input_dim
    H, L, O = 32, 2, 4         # hidden_dim, num_layers, output_dim

    key = jax.random.PRNGKey(0)
    key, xk = jax.random.split(key)
    x = jax.random.normal(xk, (B, T, D), jnp.float32)   # batch-first input (B, T, D)

    params = init_params(key, D, H, L, O)

    out = jax.jit(functools.partial(lstm_model_forward, params=params))(x)
    out = jax.block_until_ready(out)
    assert out.shape == (B, O)
    print("KERNEL_OK")
</pallas_src>

<mosaic_0001>
module attributes {stable_mosaic.version = 11 : i64} {
  func.func @kernel(%arg0: memref<8x8x8xf32, #tpu.memory_space<vmem>>, %arg1: memref<8x128xbf16, #tpu.memory_space<vmem>>, %arg2: memref<32x128xbf16, #tpu.memory_space<vmem>>, %arg3: memref<1x128xf32, #tpu.memory_space<vmem>>, %arg4: memref<32x128xbf16, #tpu.memory_space<vmem>>, %arg5: memref<32x128xbf16, #tpu.memory_space<vmem>>, %arg6: memref<1x128xf32, #tpu.memory_space<vmem>>, %arg7: memref<32x4xbf16, #tpu.memory_space<vmem>>, %arg8: memref<1x4xf32, #tpu.memory_space<vmem>>, %arg9: memref<8x4xf32, #tpu.memory_space<vmem>>, %arg10: memref<8x8x32xf32, #tpu.memory_space<vmem>>) attributes {dimension_semantics = [], scalar_prefetch = 0 : i64, scratch_operands = 1 : i64, tpu.core_type = #tpu.core_type<tc>} {
    %c0 = arith.constant 0 : index
    %c0_0 = arith.constant 0 : index
    %c0_1 = arith.constant 0 : index
    %0 = vector.load %arg0[%c0, %c0_0, %c0_1] : memref<8x8x8xf32, #tpu.memory_space<vmem>>, vector<8x8x8xf32>
    %1 = tpu.transpose %0, [1, 0, 2] : vector<8x8x8xf32> -> vector<8x8x8xf32>
    %c0_2 = arith.constant 0 : index
    %c0_3 = arith.constant 0 : index
    %2 = vector.load %arg1[%c0_2, %c0_3] : memref<8x128xbf16, #tpu.memory_space<vmem>>, vector<8x128xbf16>
    %c0_4 = arith.constant 0 : index
    %c0_5 = arith.constant 0 : index
    %3 = vector.load %arg2[%c0_4, %c0_5] : memref<32x128xbf16, #tpu.memory_space<vmem>>, vector<32x128xbf16>
    %c0_6 = arith.constant 0 : index
    %c0_7 = arith.constant 0 : index
    %4 = vector.load %arg3[%c0_6, %c0_7] : memref<1x128xf32, #tpu.memory_space<vmem>>, vector<1x128xf32>
    %5 = vector.shape_cast %1 : vector<8x8x8xf32> to vector<64x8xf32>
    %6 = arith.truncf %5 : vector<64x8xf32> to vector<64x8xbf16>
    %cst = arith.constant dense<0.000000e+00> : vector<64x128xf32>
    %7 = tpu.matmul %6, %2, %cst {dimension_numbers = #tpu.dot_dimension_numbers<[1], [0], [0], [1], [0, 0, 1, 1], [], []>} : vector<64x8xbf16>, vector<8x128xbf16>, vector<64x128xf32> -> vector<64x128xf32>
    %8 = vector.broadcast %4 : vector<1x128xf32> to vector<64x128xf32>
    %9 = arith.addf %7, %8 : vector<64x128xf32>
    %10 = vector.shape_cast %9 : vector<64x128xf32> to vector<8x8x128xf32>
    %cst_8 = arith.constant 0.000000e+00 : f32
    %11 = vector.broadcast %cst_8 : f32 to vector<8x32xf32>
    %cst_9 = arith.constant 0.000000e+00 : f32
    %12 = vector.broadcast %cst_9 : f32 to vector<8x32xf32>
    %13 = vector.extract_strided_slice %10 {offsets = [0, 0, 0], sizes = [1, 8, 128], strides = [1, 1, 1]} : vector<8x8x128xf32> to vector<1x8x128xf32>
    %14 = vector.shape_cast %13 : vector<1x8x128xf32> to vector<8x128xf32>
    %15 = arith.truncf %11 : vector<8x32xf32> to vector<8x32xbf16>
    %cst_10 = arith.constant dense<0.000000e+00> : vector<8x128xf32>
    %16 = tpu.matmul %15, %3, %cst_10 {dimension_numbers = #tpu.dot_dimension_numbers<[1], [0], [0], [1], [0, 0, 1, 1], [], []>} : vector<8x32xbf16>, vector<32x128xbf16>, vector<8x128xf32> -> vector<8x128xf32>
    %17 = arith.addf %14, %16 : vector<8x128xf32>
    %18 = vector.extract_strided_slice %17 {offsets = [0, 0], sizes = [8, 32], strides = [1, 1]} : vector<8x128xf32> to vector<8x32xf32>
    %19 = arith.negf %18 : vector<8x32xf32>
    %20 = math.exp %19 : vector<8x32xf32>
    %cst_11 = arith.constant 1.000000e+00 : f32
    %21 = vector.broadcast %cst_11 : f32 to vector<8x32xf32>
    %22 = arith.addf %21, %20 : vector<8x32xf32>
    %23 = arith.divf %21, %22 : vector<8x32xf32>
    %24 = vector.extract_strided_slice %17 {offsets = [0, 32], sizes = [8, 32], strides = [1, 1]} : vector<8x128xf32> to vector<8x32xf32>
    %25 = arith.negf %24 : vector<8x32xf32>
    %26 = math.exp %25 : vector<8x32xf32>
    %cst_12 = arith.constant 1.000000e+00 : f32
    %27 = vector.broadcast %cst_12 : f32 to vector<8x32xf32>
    %28 = arith.addf %27, %26 : vector<8x32xf32>
    %29 = arith.divf %27, %28 : vector<8x32xf32>
    %30 = vector.extract_strided_slice %17 {offsets = [0, 64], sizes = [8, 32], strides = [1, 1]} : vector<8x128xf32> to vector<8x32xf32>
    %31 = math.tanh %30 : vector<8x32xf32>
    %32 = vector.extract_strided_slice %17 {offsets = [0, 96], sizes = [8, 32], strides = [1, 1]} : vector<8x128xf32> to vector<8x32xf32>
    %33 = arith.negf %32 : vector<8x32xf32>
    %34 = math.exp %33 : vector<8x32xf32>
    %cst_13 = arith.constant 1.000000e+00 : f32
    %35 = vector.broadcast %cst_13 : f32 to vector<8x32xf32>
    %36 = arith.addf %35, %34 : vector<8x32xf32>
    %37 = arith.divf %35, %36 : vector<8x32xf32>
    %38 = arith.mulf %29, %12 : vector<8x32xf32>
    %39 = arith.mulf %23, %31 : vector<8x32xf32>
    %40 = arith.addf %38, %39 : vector<8x32xf32>
    %41 = math.tanh %40 : vector<8x32xf32>
    %42 = arith.mulf %37, %41 : vector<8x32xf32>
    %c0_14 = arith.constant 0 : index
    %c0_15 = arith.constant 0 : index
    %c0_16 = arith.constant 0 : index
    %43 = vector.load %arg10[%c0_14, %c0_15, %c0_16] : memref<8x8x32xf32, #tpu.memory_space<vmem>>, vector<1x8x32xf32>
    %44 = vector.shape_cast %43 : vector<1x8x32xf32> to vector<8x32xf32>
    %45 = vector.shape_cast %42 : vector<8x32xf32> to vector<1x8x32xf32>
    tpu.vector_store %arg10[%c0_14, %c0_15, %c0_16], %45 {strides = array<i32>} : memref<8x8x32xf32, #tpu.memory_space<vmem>>, vector<1x8x32xf32>,
    %46 = vector.extract_strided_slice %10 {offsets = [1, 0, 0], sizes = [1, 8, 128], strides = [1, 1, 1]} : vector<8x8x128xf32> to vector<1x8x128xf32>
    %47 = vector.shape_cast %46 : vector<1x8x128xf32> to vector<8x128xf32>
    %48 = arith.truncf %42 : vector<8x32xf32> to vector<8x32xbf16>
    %cst_17 = arith.constant dense<0.000000e+00> : vector<8x128xf32>
    %49 = tpu.matmul %48, %3, %cst_17 {dimension_numbers = #tpu.dot_dimension_numbers<[1], [0], [0], [1], [0, 0, 1, 1], [], []>} : vector<8x32xbf16>, vector<32x128xbf16>, vector<8x128xf32> -> vector<8x128xf32>
    %50 = arith.addf %47, %49 : vector<8x128xf32>
    %51 = vector.extract_strided_slice %50 {offsets = [0, 0], sizes = [8, 32], strides = [1, 1]} : vector<8x128xf32> to vector<8x32xf32>
    %52 = arith.negf %51 : vector<8x32xf32>
    %53 = math.exp %52 : vector<8x32xf32>
    %cst_18 = arith.constant 1.000000e+00 : f32
    %54 = vector.broadcast %cst_18 : f32 to vector<8x32xf32>
    %55 = arith.addf %54, %53 : vector<8x32xf32>
    %56 = arith.divf %54, %55 : vector<8x32xf32>
    %57 = vector.extract_strided_slice %50 {offsets = [0, 32], sizes = [8, 32], strides = [1, 1]} : vector<8x128xf32> to vector<8x32xf32>
    %58 = arith.negf %57 : vector<8x32xf32>
    %59 = math.exp %58 : vector<8x32xf32>
    %cst_19 = arith.constant 1.000000e+00 : f32
    %60 = vector.broadcast %cst_19 : f32 to vector<8x32xf32>
    %61 = arith.addf %60, %59 : vector<8x32xf32>
    %62 = arith.divf %60, %61 : vector<8x32xf32>
    %63 = vector.extract_strided_slice %50 {offsets = [0, 64], sizes = [8, 32], strides = [1, 1]} : vector<8x128xf32> to vector<8x32xf32>
    %64 = math.tanh %63 : vector<8x32xf32>
    %65 = vector.extract_strided_slice %50 {offsets = [0, 96], sizes = [8, 32], strides = [1, 1]} : vector<8x128xf32> to vector<8x32xf32>
    %66 = arith.negf %65 : vector<8x32xf32>
    %67 = math.exp %66 : vector<8x32xf32>
    %cst_20 = arith.constant 1.000000e+00 : f32
    %68 = vector.broadcast %cst_20 : f32 to vector<8x32xf32>
    %69 = arith.addf %68, %67 : vector<8x32xf32>
    %70 = arith.divf %68, %69 : vector<8x32xf32>
    %71 = arith.mulf %62, %40 : vector<8x32xf32>
    %72 = arith.mulf %56, %64 : vector<8x32xf32>
    %73 = arith.addf %71, %72 : vector<8x32xf32>
    %74 = math.tanh %73 : vector<8x32xf32>
    %75 = arith.mulf %70, %74 : vector<8x32xf32>
    %c1 = arith.constant 1 : index
    %c0_21 = arith.constant 0 : index
    %c0_22 = arith.constant 0 : index
    %76 = vector.load %arg10[%c1, %c0_21, %c0_22] : memref<8x8x32xf32, #tpu.memory_space<vmem>>, vector<1x8x32xf32>
    %77 = vector.shape_cast %76 : vector<1x8x32xf32> to vector<8x32xf32>
    %78 = vector.shape_cast %75 : vector<8x32xf32> to vector<1x8x32xf32>
    tpu.vector_store %arg10[%c1, %c0_21, %c0_22], %78 {strides = array<i32>} : memref<8x8x32xf32, #tpu.memory_space<vmem>>, vector<1x8x32xf32>,
    %79 = vector.extract_strided_slice %10 {offsets = [2, 0, 0], sizes = [1, 8, 128], strides = [1, 1, 1]} : vector<8x8x128xf32> to vector<1x8x128xf32>
    %80 = vector.shape_cast %79 : vector<1x8x128xf32> to vector<8x128xf32>
    %81 = arith.truncf %75 : vector<8x32xf32> to vector<8x32xbf16>
    %cst_23 = arith.constant dense<0.000000e+00> : vector<8x128xf32>
    %82 = tpu.matmul %81, %3, %cst_23 {dimension_numbers = #tpu.dot_dimension_numbers<[1], [0], [0], [1], [0, 0, 1, 1], [], []>} : vector<8x32xbf16>, vector<32x128xbf16>, vector<8x128xf32> -> vector<8x128xf32>
    %83 = arith.addf %80, %82 : vector<8x128xf32>
    %84 = vector.extract_strided_slice %83 {offsets = [0, 0], sizes = [8, 32], strides = [1, 1]} : vector<8x128xf32> to vector<8x32xf32>
    %85 = arith.negf %84 : vector<8x32xf32>
    %86 = math.exp %85 : vector<8x32xf32>
    %cst_24 = arith.constant 1.000000e+00 : f32
    %87 = vector.broadcast %cst_24 : f32 to vector<8x32xf32>
    %88 = arith.addf %87, %86 : vector<8x32xf32>
    %89 = arith.divf %87, %88 : vector<8x32xf32>
    %90 = vector.extract_strided_slice %83 {offsets = [0, 32], sizes = [8, 32], strides = [1, 1]} : vector<8x128xf32> to vector<8x32xf32>
    %91 = arith.negf %90 : vector<8x32xf32>
    %92 = math.exp %91 : vector<8x32xf32>
    %cst_25 = arith.constant 1.000000e+00 : f32
    %93 = vector.broadcast %cst_25 : f32 to vector<8x32xf32>
    %94 = arith.addf %93, %92 : vector<8x32xf32>
    %95 = arith.divf %93, %94 : vector<8x32xf32>
    %96 = vector.extract_strided_slice %83 {offsets = [0, 64], sizes = [8, 32], strides = [1, 1]} : vector<8x128xf32> to vector<8x32xf32>
    %97 = math.tanh %96 : vector<8x32xf32>
    %98 = vector.extract_strided_slice %83 {offsets = [0, 96], sizes = [8, 32], strides = [1, 1]} : vector<8x128xf32> to vector<8x32xf32>
    %99 = arith.negf %98 : vector<8x32xf32>
    %100 = math.exp %99 : vector<8x32xf32>
    %cst_26 = arith.constant 1.000000e+00 : f32
    %101 = vector.broadcast %cst_26 : f32 to vector<8x32xf32>
    %102 = arith.addf %101, %100 : vector<8x32xf32>
    %103 = arith.divf %101, %102 : vector<8x32xf32>
    %104 = arith.mulf %95, %73 : vector<8x32xf32>
    %105 = arith.mulf %89, %97 : vector<8x32xf32>
    %106 = arith.addf %104, %105 : vector<8x32xf32>
    %107 = math.tanh %106 : vector<8x32xf32>
    %108 = arith.mulf %103, %107 : vector<8x32xf32>
    %c2 = arith.constant 2 : index
    %c0_27 = arith.constant 0 : index
    %c0_28 = arith.constant 0 : index
    %109 = vector.load %arg10[%c2, %c0_27, %c0_28] : memref<8x8x32xf32, #tpu.memory_space<vmem>>, vector<1x8x32xf32>
    %110 = vector.shape_cast %109 : vector<1x8x32xf32> to vector<8x32xf32>
    %111 = vector.shape_cast %108 : vector<8x32xf32> to vector<1x8x32xf32>
    tpu.vector_store %arg10[%c2, %c0_27, %c0_28], %111 {strides = array<i32>} : memref<8x8x32xf32, #tpu.memory_space<vmem>>, vector<1x8x32xf32>,
    %112 = vector.extract_strided_slice %10 {offsets = [3, 0, 0], sizes = [1, 8, 128], strides = [1, 1, 1]} : vector<8x8x128xf32> to vector<1x8x128xf32>
    %113 = vector.shape_cast %112 : vector<1x8x128xf32> to vector<8x128xf32>
    %114 = arith.truncf %108 : vector<8x32xf32> to vector<8x32xbf16>
    %cst_29 = arith.constant dense<0.000000e+00> : vector<8x128xf32>
    %115 = tpu.matmul %114, %3, %cst_29 {dimension_numbers = #tpu.dot_dimension_numbers<[1], [0], [0], [1], [0, 0, 1, 1], [], []>} : vector<8x32xbf16>, vector<32x128xbf16>, vector<8x128xf32> -> vector<8x128xf32>
    %116 = arith.addf %113, %115 : vector<8x128xf32>
    %117 = vector.extract_strided_slice %116 {offsets = [0, 0], sizes = [8, 32], strides = [1, 1]} : vector<8x128xf32> to vector<8x32xf32>
    %118 = arith.negf %117 : vector<8x32xf32>
    %119 = math.exp %118 : vector<8x32xf32>
    %cst_30 = arith.constant 1.000000e+00 : f32
    %120 = vector.broadcast %cst_30 : f32 to vector<8x32xf32>
    %121 = arith.addf %120, %119 : vector<8x32xf32>
    %122 = arith.divf %120, %121 : vector<8x32xf32>
    %123 = vector.extract_strided_slice %116 {offsets = [0, 32], sizes = [8, 32], strides = [1, 1]} : vector<8x128xf32> to vector<8x32xf32>
    %124 = arith.negf %123 : vector<8x32xf32>
    %125 = math.exp %124 : vector<8x32xf32>
    %cst_31 = arith.constant 1.000000e+00 : f32
    %126 = vector.broadcast %cst_31 : f32 to vector<8x32xf32>
    %127 = arith.addf %126, %125 : vector<8x32xf32>
    %128 = arith.divf %126, %127 : vector<8x32xf32>
    %129 = vector.extract_strided_slice %116 {offsets = [0, 64], sizes = [8, 32], strides = [1, 1]} : vector<8x128xf32> to vector<8x32xf32>
    %130 = math.tanh %129 : vector<8x32xf32>
    %131 = vector.extract_strided_slice %116 {offsets = [0, 96], sizes = [8, 32], strides = [1, 1]} : vector<8x128xf32> to vector<8x32xf32>
    %132 = arith.negf %131 : vector<8x32xf32>
    %133 = math.exp %132 : vector<8x32xf32>
    %cst_32 = arith.constant 1.000000e+00 : f32
    %134 = vector.broadcast %cst_32 : f32 to vector<8x32xf32>
    %135 = arith.addf %134, %133 : vector<8x32xf32>
    %136 = arith.divf %134, %135 : vector<8x32xf32>
    %137 = arith.mulf %128, %106 : vector<8x32xf32>
    %138 = arith.mulf %122, %130 : vector<8x32xf32>
    %139 = arith.addf %137, %138 : vector<8x32xf32>
    %140 = math.tanh %139 : vector<8x32xf32>
    %141 = arith.mulf %136, %140 : vector<8x32xf32>
    %c3 = arith.constant 3 : index
    %c0_33 = arith.constant 0 : index
    %c0_34 = arith.constant 0 : index
    %142 = vector.load %arg10[%c3, %c0_33, %c0_34] : memref<8x8x32xf32, #tpu.memory_space<vmem>>, vector<1x8x32xf32>
    %143 = vector.shape_cast %142 : vector<1x8x32xf32> to vector<8x32xf32>
    %144 = vector.shape_cast %141 : vector<8x32xf32> to vector<1x8x32xf32>
    tpu.vector_store %arg10[%c3, %c0_33, %c0_34], %144 {strides = array<i32>} : memref<8x8x32xf32, #tpu.memory_space<vmem>>, vector<1x8x32xf32>,
    %145 = vector.extract_strided_slice %10 {offsets = [4, 0, 0], sizes = [1, 8, 128], strides = [1, 1, 1]} : vector<8x8x128xf32> to vector<1x8x128xf32>
    %146 = vector.shape_cast %145 : vector<1x8x128xf32> to vector<8x128xf32>
    %147 = arith.truncf %141 : vector<8x32xf32> to vector<8x32xbf16>
    %cst_35 = arith.constant dense<0.000000e+00> : vector<8x128xf32>
    %148 = tpu.matmul %147, %3, %cst_35 {dimension_numbers = #tpu.dot_dimension_numbers<[1], [0], [0], [1], [0, 0, 1, 1], [], []>} : vector<8x32xbf16>, vector<32x128xbf16>, vector<8x128xf32> -> vector<8x128xf32>
    %149 = arith.addf %146, %148 : vector<8x128xf32>
    %150 = vector.extract_strided_slice %149 {offsets = [0, 0], sizes = [8, 32], strides = [1, 1]} : vector<8x128xf32> to vector<8x32xf32>
    %151 = arith.negf %150 : vector<8x32xf32>
    %152 = math.exp %151 : vector<8x32xf32>
    %cst_36 = arith.constant 1.000000e+00 : f32
    %153 = vector.broadcast %cst_36 : f32 to vector<8x32xf32>
    %154 = arith.addf %153, %152 : vector<8x32xf32>
    %155 = arith.divf %153, %154 : vector<8x32xf32>
    %156 = vector.extract_strided_slice %149 {offsets = [0, 32], sizes = [8, 32], strides = [1, 1]} : vector<8x128xf32> to vector<8x32xf32>
    %157 = arith.negf %156 : vector<8x32xf32>
    %158 = math.exp %157 : vector<8x32xf32>
    %cst_37 = arith.constant 1.000000e+00 : f32
    %159 = vector.broadcast %cst_37 : f32 to vector<8x32xf32>
    %160 = arith.addf %159, %158 : vector<8x32xf32>
    %161 = arith.divf %159, %160 : vector<8x32xf32>
    %162 = vector.extract_strided_slice %149 {offsets = [0, 64], sizes = [8, 32], strides = [1, 1]} : vector<8x128xf32> to vector<8x32xf32>
    %163 = math.tanh %162 : vector<8x32xf32>
    %164 = vector.extract_strided_slice %149 {offsets = [0, 96], sizes = [8, 32], strides = [1, 1]} : vector<8x128xf32> to vector<8x32xf32>
    %165 = arith.negf %164 : vector<8x32xf32>
    %166 = math.exp %165 : vector<8x32xf32>
    %cst_38 = arith.constant 1.000000e+00 : f32
    %167 = vector.broadcast %cst_38 : f32 to vector<8x32xf32>
    %168 = arith.addf %167, %166 : vector<8x32xf32>
    %169 = arith.divf %167, %168 : vector<8x32xf32>
    %170 = arith.mulf %161, %139 : vector<8x32xf32>
    %171 = arith.mulf %155, %163 : vector<8x32xf32>
    %172 = arith.addf %170, %171 : vector<8x32xf32>
    %173 = math.tanh %172 : vector<8x32xf32>
    %174 = arith.mulf %169, %173 : vector<8x32xf32>
    %c4 = arith.constant 4 : index
    %c0_39 = arith.constant 0 : index
    %c0_40 = arith.constant 0 : index
    %175 = vector.load %arg10[%c4, %c0_39, %c0_40] : memref<8x8x32xf32, #tpu.memory_space<vmem>>, vector<1x8x32xf32>
    %176 = vector.shape_cast %175 : vector<1x8x32xf32> to vector<8x32xf32>
    %177 = vector.shape_cast %174 : vector<8x32xf32> to vector<1x8x32xf32>
    tpu.vector_store %arg10[%c4, %c0_39, %c0_40], %177 {strides = array<i32>} : memref<8x8x32xf32, #tpu.memory_space<vmem>>, vector<1x8x32xf32>,
    %178 = vector.extract_strided_slice %10 {offsets = [5, 0, 0], sizes = [1, 8, 128], strides = [1, 1, 1]} : vector<8x8x128xf32> to vector<1x8x128xf32>
    %179 = vector.shape_cast %178 : vector<1x8x128xf32> to vector<8x128xf32>
    %180 = arith.truncf %174 : vector<8x32xf32> to vector<8x32xbf16>
    %cst_41 = arith.constant dense<0.000000e+00> : vector<8x128xf32>
    %181 = tpu.matmul %180, %3, %cst_41 {dimension_numbers = #tpu.dot_dimension_numbers<[1], [0], [0], [1], [0, 0, 1, 1], [], []>} : vector<8x32xbf16>, vector<32x128xbf16>, vector<8x128xf32> -> vector<8x128xf32>
    %182 = arith.addf %179, %181 : vector<8x128xf32>
    %183 = vector.extract_strided_slice %182 {offsets = [0, 0], sizes = [8, 32], strides = [1, 1]} : vector<8x128xf32> to vector<8x32xf32>
    %184 = arith.negf %183 : vector<8x32xf32>
    %185 = math.exp %184 : vector<8x32xf32>
    %cst_42 = arith.constant 1.000000e+00 : f32
    %186 = vector.broadcast %cst_42 : f32 to vector<8x32xf32>
    %187 = arith.addf %186, %185 : vector<8x32xf32>
    %188 = arith.divf %186, %187 : vector<8x32xf32>
    %189 = vector.extract_strided_slice %182 {offsets = [0, 32], sizes = [8, 32], strides = [1, 1]} : vector<8x128xf32> to vector<8x32xf32>
    %190 = arith.negf %189 : vector<8x32xf32>
    %191 = math.exp %190 : vector<8x32xf32>
    %cst_43 = arith.constant 1.000000e+00 : f32
    %192 = vector.broadcast %cst_43 : f32 to vector<8x32xf32>
    %193 = arith.addf %192, %191 : vector<8x32xf32>
    %194 = arith.divf %192, %193 : vector<8x32xf32>
    %195 = vector.extract_strided_slice %182 {offsets = [0, 64], sizes = [8, 32], strides = [1, 1]} : vector<8x128xf32> to vector<8x32xf32>
    %196 = math.tanh %195 : vector<8x32xf32>
    %197 = vector.extract_strided_slice %182 {offsets = [0, 96], sizes = [8, 32], strides = [1, 1]} : vector<8x128xf32> to vector<8x32xf32>
    %198 = arith.negf %197 : vector<8x32xf32>
    %199 = math.exp %198 : vector<8x32xf32>
    %cst_44 = arith.constant 1.000000e+00 : f32
    %200 = vector.broadcast %cst_44 : f32 to vector<8x32xf32>
    %201 = arith.addf %200, %199 : vector<8x32xf32>
    %202 = arith.divf %200, %201 : vector<8x32xf32>
    %203 = arith.mulf %194, %172 : vector<8x32xf32>
    %204 = arith.mulf %188, %196 : vector<8x32xf32>
    %205 = arith.addf %203, %204 : vector<8x32xf32>
    %206 = math.tanh %205 : vector<8x32xf32>
    %207 = arith.mulf %202, %206 : vector<8x32xf32>
    %c5 = arith.constant 5 : index
    %c0_45 = arith.constant 0 : index
    %c0_46 = arith.constant 0 : index
    %208 = vector.load %arg10[%c5, %c0_45, %c0_46] : memref<8x8x32xf32, #tpu.memory_space<vmem>>, vector<1x8x32xf32>
    %209 = vector.shape_cast %208 : vector<1x8x32xf32> to vector<8x32xf32>
    %210 = vector.shape_cast %207 : vector<8x32xf32> to vector<1x8x32xf32>
    tpu.vector_store %arg10[%c5, %c0_45, %c0_46], %210 {strides = array<i32>} : memref<8x8x32xf32, #tpu.memory_space<vmem>>, vector<1x8x32xf32>,
    %211 = vector.extract_strided_slice %10 {offsets = [6, 0, 0], sizes = [1, 8, 128], strides = [1, 1, 1]} : vector<8x8x128xf32> to vector<1x8x128xf32>
    %212 = vector.shape_cast %211 : vector<1x8x128xf32> to vector<8x128xf32>
    %213 = arith.truncf %207 : vector<8x32xf32> to vector<8x32xbf16>
    %cst_47 = arith.constant dense<0.000000e+00> : vector<8x128xf32>
    %214 = tpu.matmul %213, %3, %cst_47 {dimension_numbers = #tpu.dot_dimension_numbers<[1], [0], [0], [1], [0, 0, 1, 1], [], []>} : vector<8x32xbf16>, vector<32x128xbf16>, vector<8x128xf32> -> vector<8x128xf32>
    %215 = arith.addf %212, %214 : vector<8x128xf32>
    %216 = vector.extract_strided_slice %215 {offsets = [0, 0], sizes = [8, 32], strides = [1, 1]} : vector<8x128xf32> to vector<8x32xf32>
    %217 = arith.negf %216 : vector<8x32xf32>
    %218 = math.exp %217 : vector<8x32xf32>
    %cst_48 = arith.constant 1.000000e+00 : f32
    %219 = vector.broadcast %cst_48 : f32 to vector<8x32xf32>
    %220 = arith.addf %219, %218 : vector<8x32xf32>
    %221 = arith.divf %219, %220 : vector<8x32xf32>
    %222 = vector.extract_strided_slice %215 {offsets = [0, 32], sizes = [8, 32], strides = [1, 1]} : vector<8x128xf32> to vector<8x32xf32>
    %223 = arith.negf %222 : vector<8x32xf32>
    %224 = math.exp %223 : vector<8x32xf32>
    %cst_49 = arith.constant 1.000000e+00 : f32
    %225 = vector.broadcast %cst_49 : f32 to vector<8x32xf32>
    %226 = arith.addf %225, %224 : vector<8x32xf32>
    %227 = arith.divf %225, %226 : vector<8x32xf32>
    %228 = vector.extract_strided_slice %215 {offsets = [0, 64], sizes = [8, 32], strides = [1, 1]} : vector<8x128xf32> to vector<8x32xf32>
    %229 = math.tanh %228 : vector<8x32xf32>
    %230 = vector.extract_strided_slice %215 {offsets = [0, 96], sizes = [8, 32], strides = [1, 1]} : vector<8x128xf32> to vector<8x32xf32>
    %231 = arith.negf %230 : vector<8x32xf32>
    %232 = math.exp %231 : vector<8x32xf32>
    %cst_50 = arith.constant 1.000000e+00 : f32
    %233 = vector.broadcast %cst_50 : f32 to vector<8x32xf32>
    %234 = arith.addf %233, %232 : vector<8x32xf32>
    %235 = arith.divf %233, %234 : vector<8x32xf32>
    %236 = arith.mulf %227, %205 : vector<8x32xf32>
    %237 = arith.mulf %221, %229 : vector<8x32xf32>
    %238 = arith.addf %236, %237 : vector<8x32xf32>
    %239 = math.tanh %238 : vector<8x32xf32>
    %240 = arith.mulf %235, %239 : vector<8x32xf32>
    %c6 = arith.constant 6 : index
    %c0_51 = arith.constant 0 : index
    %c0_52 = arith.constant 0 : index
    %241 = vector.load %arg10[%c6, %c0_51, %c0_52] : memref<8x8x32xf32, #tpu.memory_space<vmem>>, vector<1x8x32xf32>
    %242 = vector.shape_cast %241 : vector<1x8x32xf32> to vector<8x32xf32>
    %243 = vector.shape_cast %240 : vector<8x32xf32> to vector<1x8x32xf32>
    tpu.vector_store %arg10[%c6, %c0_51, %c0_52], %243 {strides = array<i32>} : memref<8x8x32xf32, #tpu.memory_space<vmem>>, vector<1x8x32xf32>,
    %244 = vector.extract_strided_slice %10 {offsets = [7, 0, 0], sizes = [1, 8, 128], strides = [1, 1, 1]} : vector<8x8x128xf32> to vector<1x8x128xf32>
    %245 = vector.shape_cast %244 : vector<1x8x128xf32> to vector<8x128xf32>
    %246 = arith.truncf %240 : vector<8x32xf32> to vector<8x32xbf16>
    %cst_53 = arith.constant dense<0.000000e+00> : vector<8x128xf32>
    %247 = tpu.matmul %246, %3, %cst_53 {dimension_numbers = #tpu.dot_dimension_numbers<[1], [0], [0], [1], [0, 0, 1, 1], [], []>} : vector<8x32xbf16>, vector<32x128xbf16>, vector<8x128xf32> -> vector<8x128xf32>
    %248 = arith.addf %245, %247 : vector<8x128xf32>
    %249 = vector.extract_strided_slice %248 {offsets = [0, 0], sizes = [8, 32], strides = [1, 1]} : vector<8x128xf32> to vector<8x32xf32>
    %250 = arith.negf %249 : vector<8x32xf32>
    %251 = math.exp %250 : vector<8x32xf32>
    %cst_54 = arith.constant 1.000000e+00 : f32
    %252 = vector.broadcast %cst_54 : f32 to vector<8x32xf32>
    %253 = arith.addf %252, %251 : vector<8x32xf32>
    %254 = arith.divf %252, %253 : vector<8x32xf32>
    %255 = vector.extract_strided_slice %248 {offsets = [0, 32], sizes = [8, 32], strides = [1, 1]} : vector<8x128xf32> to vector<8x32xf32>
    %256 = arith.negf %255 : vector<8x32xf32>
    %257 = math.exp %256 : vector<8x32xf32>
    %cst_55 = arith.constant 1.000000e+00 : f32
    %258 = vector.broadcast %cst_55 : f32 to vector<8x32xf32>
    %259 = arith.addf %258, %257 : vector<8x32xf32>
    %260 = arith.divf %258, %259 : vector<8x32xf32>
    %261 = vector.extract_strided_slice %248 {offsets = [0, 64], sizes = [8, 32], strides = [1, 1]} : vector<8x128xf32> to vector<8x32xf32>
    %262 = math.tanh %261 : vector<8x32xf32>
    %263 = vector.extract_strided_slice %248 {offsets = [0, 96], sizes = [8, 32], strides = [1, 1]} : vector<8x128xf32> to vector<8x32xf32>
    %264 = arith.negf %263 : vector<8x32xf32>
    %265 = math.exp %264 : vector<8x32xf32>
    %cst_56 = arith.constant 1.000000e+00 : f32
    %266 = vector.broadcast %cst_56 : f32 to vector<8x32xf32>
    %267 = arith.addf %266, %265 : vector<8x32xf32>
    %268 = arith.divf %266, %267 : vector<8x32xf32>
    %269 = arith.mulf %260, %238 : vector<8x32xf32>
    %270 = arith.mulf %254, %262 : vector<8x32xf32>
    %271 = arith.addf %269, %270 : vector<8x32xf32>
    %272 = math.tanh %271 : vector<8x32xf32>
    %273 = arith.mulf %268, %272 : vector<8x32xf32>
    %c7 = arith.constant 7 : index
    %c0_57 = arith.constant 0 : index
    %c0_58 = arith.constant 0 : index
    %274 = vector.load %arg10[%c7, %c0_57, %c0_58] : memref<8x8x32xf32, #tpu.memory_space<vmem>>, vector<1x8x32xf32>
    %275 = vector.shape_cast %274 : vector<1x8x32xf32> to vector<8x32xf32>
    %276 = vector.shape_cast %273 : vector<8x32xf32> to vector<1x8x32xf32>
    tpu.vector_store %arg10[%c7, %c0_57, %c0_58], %276 {strides = array<i32>} : memref<8x8x32xf32, #tpu.memory_space<vmem>>, vector<1x8x32xf32>,
    %c0_59 = arith.constant 0 : index
    %c0_60 = arith.constant 0 : index
    %277 = vector.load %arg4[%c0_59, %c0_60] : memref<32x128xbf16, #tpu.memory_space<vmem>>, vector<32x128xbf16>
    %c0_61 = arith.constant 0 : index
    %c0_62 = arith.constant 0 : index
    %278 = vector.load %arg5[%c0_61, %c0_62] : memref<32x128xbf16, #tpu.memory_space<vmem>>, vector<32x128xbf16>
    %c0_63 = arith.constant 0 : index
    %c0_64 = arith.constant 0 : index
    %279 = vector.load %arg6[%c0_63, %c0_64] : memref<1x128xf32, #tpu.memory_space<vmem>>, vector<1x128xf32>
    %c0_65 = arith.constant 0 : index
    %c0_66 = arith.constant 0 : index
    %c0_67 = arith.constant 0 : index
    %280 = vector.load %arg10[%c0_65, %c0_66, %c0_67] : memref<8x8x32xf32, #tpu.memory_space<vmem>>, vector<8x8x32xf32>
    %281 = vector.shape_cast %280 : vector<8x8x32xf32> to vector<64x32xf32>
    %282 = arith.truncf %281 : vector<64x32xf32> to vector<64x32xbf16>
    %cst_68 = arith.constant dense<0.000000e+00> : vector<64x128xf32>
    %283 = tpu.matmul %282, %277, %cst_68 {dimension_numbers = #tpu.dot_dimension_numbers<[1], [0], [0], [1], [0, 0, 1, 1], [], []>} : vector<64x32xbf16>, vector<32x128xbf16>, vector<64x128xf32> -> vector<64x128xf32>
    %284 = vector.broadcast %279 : vector<1x128xf32> to vector<64x128xf32>
    %285 = arith.addf %283, %284 : vector<64x128xf32>
    %286 = vector.shape_cast %285 : vector<64x128xf32> to vector<8x8x128xf32>
    %cst_69 = arith.constant 0.000000e+00 : f32
    %287 = vector.broadcast %cst_69 : f32 to vector<8x32xf32>
    %cst_70 = arith.constant 0.000000e+00 : f32
    %288 = vector.broadcast %cst_70 : f32 to vector<8x32xf32>
    %289 = vector.extract_strided_slice %286 {offsets = [0, 0, 0], sizes = [1, 8, 128], strides = [1, 1, 1]} : vector<8x8x128xf32> to vector<1x8x128xf32>
    %290 = vector.shape_cast %289 : vector<1x8x128xf32> to vector<8x128xf32>
    %291 = arith.truncf %287 : vector<8x32xf32> to vector<8x32xbf16>
    %cst_71 = arith.constant dense<0.000000e+00> : vector<8x128xf32>
    %292 = tpu.matmul %291, %278, %cst_71 {dimension_numbers = #tpu.dot_dimension_numbers<[1], [0], [0], [1], [0, 0, 1, 1], [], []>} : vector<8x32xbf16>, vector<32x128xbf16>, vector<8x128xf32> -> vector<8x128xf32>
    %293 = arith.addf %290, %292 : vector<8x128xf32>
    %294 = vector.extract_strided_slice %293 {offsets = [0, 0], sizes = [8, 32], strides = [1, 1]} : vector<8x128xf32> to vector<8x32xf32>
    %295 = arith.negf %294 : vector<8x32xf32>
    %296 = math.exp %295 : vector<8x32xf32>
    %cst_72 = arith.constant 1.000000e+00 : f32
    %297 = vector.broadcast %cst_72 : f32 to vector<8x32xf32>
    %298 = arith.addf %297, %296 : vector<8x32xf32>
    %299 = arith.divf %297, %298 : vector<8x32xf32>
    %300 = vector.extract_strided_slice %293 {offsets = [0, 32], sizes = [8, 32], strides = [1, 1]} : vector<8x128xf32> to vector<8x32xf32>
    %301 = arith.negf %300 : vector<8x32xf32>
    %302 = math.exp %301 : vector<8x32xf32>
    %cst_73 = arith.constant 1.000000e+00 : f32
    %303 = vector.broadcast %cst_73 : f32 to vector<8x32xf32>
    %304 = arith.addf %303, %302 : vector<8x32xf32>
    %305 = arith.divf %303, %304 : vector<8x32xf32>
    %306 = vector.extract_strided_slice %293 {offsets = [0, 64], sizes = [8, 32], strides = [1, 1]} : vector<8x128xf32> to vector<8x32xf32>
    %307 = math.tanh %306 : vector<8x32xf32>
    %308 = vector.extract_strided_slice %293 {offsets = [0, 96], sizes = [8, 32], strides = [1, 1]} : vector<8x128xf32> to vector<8x32xf32>
    %309 = arith.negf %308 : vector<8x32xf32>
    %310 = math.exp %309 : vector<8x32xf32>
    %cst_74 = arith.constant 1.000000e+00 : f32
    %311 = vector.broadcast %cst_74 : f32 to vector<8x32xf32>
    %312 = arith.addf %311, %310 : vector<8x32xf32>
    %313 = arith.divf %311, %312 : vector<8x32xf32>
    %314 = arith.mulf %305, %288 : vector<8x32xf32>
    %315 = arith.mulf %299, %307 : vector<8x32xf32>
    %316 = arith.addf %314, %315 : vector<8x32xf32>
    %317 = math.tanh %316 : vector<8x32xf32>
    %318 = arith.mulf %313, %317 : vector<8x32xf32>
    %319 = vector.extract_strided_slice %286 {offsets = [1, 0, 0], sizes = [1, 8, 128], strides = [1, 1, 1]} : vector<8x8x128xf32> to vector<1x8x128xf32>
    %320 = vector.shape_cast %319 : vector<1x8x128xf32> to vector<8x128xf32>
    %321 = arith.truncf %318 : vector<8x32xf32> to vector<8x32xbf16>
    %cst_75 = arith.constant dense<0.000000e+00> : vector<8x128xf32>
    %322 = tpu.matmul %321, %278, %cst_75 {dimension_numbers = #tpu.dot_dimension_numbers<[1], [0], [0], [1], [0, 0, 1, 1], [], []>} : vector<8x32xbf16>, vector<32x128xbf16>, vector<8x128xf32> -> vector<8x128xf32>
    %323 = arith.addf %320, %322 : vector<8x128xf32>
    %324 = vector.extract_strided_slice %323 {offsets = [0, 0], sizes = [8, 32], strides = [1, 1]} : vector<8x128xf32> to vector<8x32xf32>
    %325 = arith.negf %324 : vector<8x32xf32>
    %326 = math.exp %325 : vector<8x32xf32>
    %cst_76 = arith.constant 1.000000e+00 : f32
    %327 = vector.broadcast %cst_76 : f32 to vector<8x32xf32>
    %328 = arith.addf %327, %326 : vector<8x32xf32>
    %329 = arith.divf %327, %328 : vector<8x32xf32>
    %330 = vector.extract_strided_slice %323 {offsets = [0, 32], sizes = [8, 32], strides = [1, 1]} : vector<8x128xf32> to vector<8x32xf32>
    %331 = arith.negf %330 : vector<8x32xf32>
    %332 = math.exp %331 : vector<8x32xf32>
    %cst_77 = arith.constant 1.000000e+00 : f32
    %333 = vector.broadcast %cst_77 : f32 to vector<8x32xf32>
    %334 = arith.addf %333, %332 : vector<8x32xf32>
    %335 = arith.divf %333, %334 : vector<8x32xf32>
    %336 = vector.extract_strided_slice %323 {offsets = [0, 64], sizes = [8, 32], strides = [1, 1]} : vector<8x128xf32> to vector<8x32xf32>
    %337 = math.tanh %336 : vector<8x32xf32>
    %338 = vector.extract_strided_slice %323 {offsets = [0, 96], sizes = [8, 32], strides = [1, 1]} : vector<8x128xf32> to vector<8x32xf32>
    %339 = arith.negf %338 : vector<8x32xf32>
    %340 = math.exp %339 : vector<8x32xf32>
    %cst_78 = arith.constant 1.000000e+00 : f32
    %341 = vector.broadcast %cst_78 : f32 to vector<8x32xf32>
    %342 = arith.addf %341, %340 : vector<8x32xf32>
    %343 = arith.divf %341, %342 : vector<8x32xf32>
    %344 = arith.mulf %335, %316 : vector<8x32xf32>
    %345 = arith.mulf %329, %337 : vector<8x32xf32>
    %346 = arith.addf %344, %345 : vector<8x32xf32>
    %347 = math.tanh %346 : vector<8x32xf32>
    %348 = arith.mulf %343, %347 : vector<8x32xf32>
    %349 = vector.extract_strided_slice %286 {offsets = [2, 0, 0], sizes = [1, 8, 128], strides = [1, 1, 1]} : vector<8x8x128xf32> to vector<1x8x128xf32>
    %350 = vector.shape_cast %349 : vector<1x8x128xf32> to vector<8x128xf32>
    %351 = arith.truncf %348 : vector<8x32xf32> to vector<8x32xbf16>
    %cst_79 = arith.constant dense<0.000000e+00> : vector<8x128xf32>
    %352 = tpu.matmul %351, %278, %cst_79 {dimension_numbers = #tpu.dot_dimension_numbers<[1], [0], [0], [1], [0, 0, 1, 1], [], []>} : vector<8x32xbf16>, vector<32x128xbf16>, vector<8x128xf32> -> vector<8x128xf32>
    %353 = arith.addf %350, %352 : vector<8x128xf32>
    %354 = vector.extract_strided_slice %353 {offsets = [0, 0], sizes = [8, 32], strides = [1, 1]} : vector<8x128xf32> to vector<8x32xf32>
    %355 = arith.negf %354 : vector<8x32xf32>
    %356 = math.exp %355 : vector<8x32xf32>
    %cst_80 = arith.constant 1.000000e+00 : f32
    %357 = vector.broadcast %cst_80 : f32 to vector<8x32xf32>
    %358 = arith.addf %357, %356 : vector<8x32xf32>
    %359 = arith.divf %357, %358 : vector<8x32xf32>
    %360 = vector.extract_strided_slice %353 {offsets = [0, 32], sizes = [8, 32], strides = [1, 1]} : vector<8x128xf32> to vector<8x32xf32>
    %361 = arith.negf %360 : vector<8x32xf32>
    %362 = math.exp %361 : vector<8x32xf32>
    %cst_81 = arith.constant 1.000000e+00 : f32
    %363 = vector.broadcast %cst_81 : f32 to vector<8x32xf32>
    %364 = arith.addf %363, %362 : vector<8x32xf32>
    %365 = arith.divf %363, %364 : vector<8x32xf32>
    %366 = vector.extract_strided_slice %353 {offsets = [0, 64], sizes = [8, 32], strides = [1, 1]} : vector<8x128xf32> to vector<8x32xf32>
    %367 = math.tanh %366 : vector<8x32xf32>
    %368 = vector.extract_strided_slice %353 {offsets = [0, 96], sizes = [8, 32], strides = [1, 1]} : vector<8x128xf32> to vector<8x32xf32>
    %369 = arith.negf %368 : vector<8x32xf32>
    %370 = math.exp %369 : vector<8x32xf32>
    %cst_82 = arith.constant 1.000000e+00 : f32
    %371 = vector.broadcast %cst_82 : f32 to vector<8x32xf32>
    %372 = arith.addf %371, %370 : vector<8x32xf32>
    %373 = arith.divf %371, %372 : vector<8x32xf32>
    %374 = arith.mulf %365, %346 : vector<8x32xf32>
    %375 = arith.mulf %359, %367 : vector<8x32xf32>
    %376 = arith.addf %374, %375 : vector<8x32xf32>
    %377 = math.tanh %376 : vector<8x32xf32>
    %378 = arith.mulf %373, %377 : vector<8x32xf32>
    %379 = vector.extract_strided_slice %286 {offsets = [3, 0, 0], sizes = [1, 8, 128], strides = [1, 1, 1]} : vector<8x8x128xf32> to vector<1x8x128xf32>
    %380 = vector.shape_cast %379 : vector<1x8x128xf32> to vector<8x128xf32>
    %381 = arith.truncf %378 : vector<8x32xf32> to vector<8x32xbf16>
    %cst_83 = arith.constant dense<0.000000e+00> : vector<8x128xf32>
    %382 = tpu.matmul %381, %278, %cst_83 {dimension_numbers = #tpu.dot_dimension_numbers<[1], [0], [0], [1], [0, 0, 1, 1], [], []>} : vector<8x32xbf16>, vector<32x128xbf16>, vector<8x128xf32> -> vector<8x128xf32>
    %383 = arith.addf %380, %382 : vector<8x128xf32>
    %384 = vector.extract_strided_slice %383 {offsets = [0, 0], sizes = [8, 32], strides = [1, 1]} : vector<8x128xf32> to vector<8x32xf32>
    %385 = arith.negf %384 : vector<8x32xf32>
    %386 = math.exp %385 : vector<8x32xf32>
    %cst_84 = arith.constant 1.000000e+00 : f32
    %387 = vector.broadcast %cst_84 : f32 to vector<8x32xf32>
    %388 = arith.addf %387, %386 : vector<8x32xf32>
    %389 = arith.divf %387, %388 : vector<8x32xf32>
    %390 = vector.extract_strided_slice %383 {offsets = [0, 32], sizes = [8, 32], strides = [1, 1]} : vector<8x128xf32> to vector<8x32xf32>
    %391 = arith.negf %390 : vector<8x32xf32>
    %392 = math.exp %391 : vector<8x32xf32>
    %cst_85 = arith.constant 1.000000e+00 : f32
    %393 = vector.broadcast %cst_85 : f32 to vector<8x32xf32>
    %394 = arith.addf %393, %392 : vector<8x32xf32>
    %395 = arith.divf %393, %394 : vector<8x32xf32>
    %396 = vector.extract_strided_slice %383 {offsets = [0, 64], sizes = [8, 32], strides = [1, 1]} : vector<8x128xf32> to vector<8x32xf32>
    %397 = math.tanh %396 : vector<8x32xf32>
    %398 = vector.extract_strided_slice %383 {offsets = [0, 96], sizes = [8, 32], strides = [1, 1]} : vector<8x128xf32> to vector<8x32xf32>
    %399 = arith.negf %398 : vector<8x32xf32>
    %400 = math.exp %399 : vector<8x32xf32>
    %cst_86 = arith.constant 1.000000e+00 : f32
    %401 = vector.broadcast %cst_86 : f32 to vector<8x32xf32>
    %402 = arith.addf %401, %400 : vector<8x32xf32>
    %403 = arith.divf %401, %402 : vector<8x32xf32>
    %404 = arith.mulf %395, %376 : vector<8x32xf32>
    %405 = arith.mulf %389, %397 : vector<8x32xf32>
    %406 = arith.addf %404, %405 : vector<8x32xf32>
    %407 = math.tanh %406 : vector<8x32xf32>
    %408 = arith.mulf %403, %407 : vector<8x32xf32>
    %409 = vector.extract_strided_slice %286 {offsets = [4, 0, 0], sizes = [1, 8, 128], strides = [1, 1, 1]} : vector<8x8x128xf32> to vector<1x8x128xf32>
    %410 = vector.shape_cast %409 : vector<1x8x128xf32> to vector<8x128xf32>
    %411 = arith.truncf %408 : vector<8x32xf32> to vector<8x32xbf16>
    %cst_87 = arith.constant dense<0.000000e+00> : vector<8x128xf32>
    %412 = tpu.matmul %411, %278, %cst_87 {dimension_numbers = #tpu.dot_dimension_numbers<[1], [0], [0], [1], [0, 0, 1, 1], [], []>} : vector<8x32xbf16>, vector<32x128xbf16>, vector<8x128xf32> -> vector<8x128xf32>
    %413 = arith.addf %410, %412 : vector<8x128xf32>
    %414 = vector.extract_strided_slice %413 {offsets = [0, 0], sizes = [8, 32], strides = [1, 1]} : vector<8x128xf32> to vector<8x32xf32>
    %415 = arith.negf %414 : vector<8x32xf32>
    %416 = math.exp %415 : vector<8x32xf32>
    %cst_88 = arith.constant 1.000000e+00 : f32
    %417 = vector.broadcast %cst_88 : f32 to vector<8x32xf32>
    %418 = arith.addf %417, %416 : vector<8x32xf32>
    %419 = arith.divf %417, %418 : vector<8x32xf32>
    %420 = vector.extract_strided_slice %413 {offsets = [0, 32], sizes = [8, 32], strides = [1, 1]} : vector<8x128xf32> to vector<8x32xf32>
    %421 = arith.negf %420 : vector<8x32xf32>
    %422 = math.exp %421 : vector<8x32xf32>
    %cst_89 = arith.constant 1.000000e+00 : f32
    %423 = vector.broadcast %cst_89 : f32 to vector<8x32xf32>
    %424 = arith.addf %423, %422 : vector<8x32xf32>
    %425 = arith.divf %423, %424 : vector<8x32xf32>
    %426 = vector.extract_strided_slice %413 {offsets = [0, 64], sizes = [8, 32], strides = [1, 1]} : vector<8x128xf32> to vector<8x32xf32>
    %427 = math.tanh %426 : vector<8x32xf32>
    %428 = vector.extract_strided_slice %413 {offsets = [0, 96], sizes = [8, 32], strides = [1, 1]} : vector<8x128xf32> to vector<8x32xf32>
    %429 = arith.negf %428 : vector<8x32xf32>
    %430 = math.exp %429 : vector<8x32xf32>
    %cst_90 = arith.constant 1.000000e+00 : f32
    %431 = vector.broadcast %cst_90 : f32 to vector<8x32xf32>
    %432 = arith.addf %431, %430 : vector<8x32xf32>
    %433 = arith.divf %431, %432 : vector<8x32xf32>
    %434 = arith.mulf %425, %406 : vector<8x32xf32>
    %435 = arith.mulf %419, %427 : vector<8x32xf32>
    %436 = arith.addf %434, %435 : vector<8x32xf32>
    %437 = math.tanh %436 : vector<8x32xf32>
    %438 = arith.mulf %433, %437 : vector<8x32xf32>
    %439 = vector.extract_strided_slice %286 {offsets = [5, 0, 0], sizes = [1, 8, 128], strides = [1, 1, 1]} : vector<8x8x128xf32> to vector<1x8x128xf32>
    %440 = vector.shape_cast %439 : vector<1x8x128xf32> to vector<8x128xf32>
    %441 = arith.truncf %438 : vector<8x32xf32> to vector<8x32xbf16>
    %cst_91 = arith.constant dense<0.000000e+00> : vector<8x128xf32>
    %442 = tpu.matmul %441, %278, %cst_91 {dimension_numbers = #tpu.dot_dimension_numbers<[1], [0], [0], [1], [0, 0, 1, 1], [], []>} : vector<8x32xbf16>, vector<32x128xbf16>, vector<8x128xf32> -> vector<8x128xf32>
    %443 = arith.addf %440, %442 : vector<8x128xf32>
    %444 = vector.extract_strided_slice %443 {offsets = [0, 0], sizes = [8, 32], strides = [1, 1]} : vector<8x128xf32> to vector<8x32xf32>
    %445 = arith.negf %444 : vector<8x32xf32>
    %446 = math.exp %445 : vector<8x32xf32>
    %cst_92 = arith.constant 1.000000e+00 : f32
    %447 = vector.broadcast %cst_92 : f32 to vector<8x32xf32>
    %448 = arith.addf %447, %446 : vector<8x32xf32>
    %449 = arith.divf %447, %448 : vector<8x32xf32>
    %450 = vector.extract_strided_slice %443 {offsets = [0, 32], sizes = [8, 32], strides = [1, 1]} : vector<8x128xf32> to vector<8x32xf32>
    %451 = arith.negf %450 : vector<8x32xf32>
    %452 = math.exp %451 : vector<8x32xf32>
    %cst_93 = arith.constant 1.000000e+00 : f32
    %453 = vector.broadcast %cst_93 : f32 to vector<8x32xf32>
    %454 = arith.addf %453, %452 : vector<8x32xf32>
    %455 = arith.divf %453, %454 : vector<8x32xf32>
    %456 = vector.extract_strided_slice %443 {offsets = [0, 64], sizes = [8, 32], strides = [1, 1]} : vector<8x128xf32> to vector<8x32xf32>
    %457 = math.tanh %456 : vector<8x32xf32>
    %458 = vector.extract_strided_slice %443 {offsets = [0, 96], sizes = [8, 32], strides = [1, 1]} : vector<8x128xf32> to vector<8x32xf32>
    %459 = arith.negf %458 : vector<8x32xf32>
    %460 = math.exp %459 : vector<8x32xf32>
    %cst_94 = arith.constant 1.000000e+00 : f32
    %461 = vector.broadcast %cst_94 : f32 to vector<8x32xf32>
    %462 = arith.addf %461, %460 : vector<8x32xf32>
    %463 = arith.divf %461, %462 : vector<8x32xf32>
    %464 = arith.mulf %455, %436 : vector<8x32xf32>
    %465 = arith.mulf %449, %457 : vector<8x32xf32>
    %466 = arith.addf %464, %465 : vector<8x32xf32>
    %467 = math.tanh %466 : vector<8x32xf32>
    %468 = arith.mulf %463, %467 : vector<8x32xf32>
    %469 = vector.extract_strided_slice %286 {offsets = [6, 0, 0], sizes = [1, 8, 128], strides = [1, 1, 1]} : vector<8x8x128xf32> to vector<1x8x128xf32>
    %470 = vector.shape_cast %469 : vector<1x8x128xf32> to vector<8x128xf32>
    %471 = arith.truncf %468 : vector<8x32xf32> to vector<8x32xbf16>
    %cst_95 = arith.constant dense<0.000000e+00> : vector<8x128xf32>
    %472 = tpu.matmul %471, %278, %cst_95 {dimension_numbers = #tpu.dot_dimension_numbers<[1], [0], [0], [1], [0, 0, 1, 1], [], []>} : vector<8x32xbf16>, vector<32x128xbf16>, vector<8x128xf32> -> vector<8x128xf32>
    %473 = arith.addf %470, %472 : vector<8x128xf32>
    %474 = vector.extract_strided_slice %473 {offsets = [0, 0], sizes = [8, 32], strides = [1, 1]} : vector<8x128xf32> to vector<8x32xf32>
    %475 = arith.negf %474 : vector<8x32xf32>
    %476 = math.exp %475 : vector<8x32xf32>
    %cst_96 = arith.constant 1.000000e+00 : f32
    %477 = vector.broadcast %cst_96 : f32 to vector<8x32xf32>
    %478 = arith.addf %477, %476 : vector<8x32xf32>
    %479 = arith.divf %477, %478 : vector<8x32xf32>
    %480 = vector.extract_strided_slice %473 {offsets = [0, 32], sizes = [8, 32], strides = [1, 1]} : vector<8x128xf32> to vector<8x32xf32>
    %481 = arith.negf %480 : vector<8x32xf32>
    %482 = math.exp %481 : vector<8x32xf32>
    %cst_97 = arith.constant 1.000000e+00 : f32
    %483 = vector.broadcast %cst_97 : f32 to vector<8x32xf32>
    %484 = arith.addf %483, %482 : vector<8x32xf32>
    %485 = arith.divf %483, %484 : vector<8x32xf32>
    %486 = vector.extract_strided_slice %473 {offsets = [0, 64], sizes = [8, 32], strides = [1, 1]} : vector<8x128xf32> to vector<8x32xf32>
    %487 = math.tanh %486 : vector<8x32xf32>
    %488 = vector.extract_strided_slice %473 {offsets = [0, 96], sizes = [8, 32], strides = [1, 1]} : vector<8x128xf32> to vector<8x32xf32>
    %489 = arith.negf %488 : vector<8x32xf32>
    %490 = math.exp %489 : vector<8x32xf32>
    %cst_98 = arith.constant 1.000000e+00 : f32
    %491 = vector.broadcast %cst_98 : f32 to vector<8x32xf32>
    %492 = arith.addf %491, %490 : vector<8x32xf32>
    %493 = arith.divf %491, %492 : vector<8x32xf32>
    %494 = arith.mulf %485, %466 : vector<8x32xf32>
    %495 = arith.mulf %479, %487 : vector<8x32xf32>
    %496 = arith.addf %494, %495 : vector<8x32xf32>
    %497 = math.tanh %496 : vector<8x32xf32>
    %498 = arith.mulf %493, %497 : vector<8x32xf32>
    %499 = vector.extract_strided_slice %286 {offsets = [7, 0, 0], sizes = [1, 8, 128], strides = [1, 1, 1]} : vector<8x8x128xf32> to vector<1x8x128xf32>
    %500 = vector.shape_cast %499 : vector<1x8x128xf32> to vector<8x128xf32>
    %501 = arith.truncf %498 : vector<8x32xf32> to vector<8x32xbf16>
    %cst_99 = arith.constant dense<0.000000e+00> : vector<8x128xf32>
    %502 = tpu.matmul %501, %278, %cst_99 {dimension_numbers = #tpu.dot_dimension_numbers<[1], [0], [0], [1], [0, 0, 1, 1], [], []>} : vector<8x32xbf16>, vector<32x128xbf16>, vector<8x128xf32> -> vector<8x128xf32>
    %503 = arith.addf %500, %502 : vector<8x128xf32>
    %504 = vector.extract_strided_slice %503 {offsets = [0, 0], sizes = [8, 32], strides = [1, 1]} : vector<8x128xf32> to vector<8x32xf32>
    %505 = arith.negf %504 : vector<8x32xf32>
    %506 = math.exp %505 : vector<8x32xf32>
    %cst_100 = arith.constant 1.000000e+00 : f32
    %507 = vector.broadcast %cst_100 : f32 to vector<8x32xf32>
    %508 = arith.addf %507, %506 : vector<8x32xf32>
    %509 = arith.divf %507, %508 : vector<8x32xf32>
    %510 = vector.extract_strided_slice %503 {offsets = [0, 32], sizes = [8, 32], strides = [1, 1]} : vector<8x128xf32> to vector<8x32xf32>
    %511 = arith.negf %510 : vector<8x32xf32>
    %512 = math.exp %511 : vector<8x32xf32>
    %cst_101 = arith.constant 1.000000e+00 : f32
    %513 = vector.broadcast %cst_101 : f32 to vector<8x32xf32>
    %514 = arith.addf %513, %512 : vector<8x32xf32>
    %515 = arith.divf %513, %514 : vector<8x32xf32>
    %516 = vector.extract_strided_slice %503 {offsets = [0, 64], sizes = [8, 32], strides = [1, 1]} : vector<8x128xf32> to vector<8x32xf32>
    %517 = math.tanh %516 : vector<8x32xf32>
    %518 = vector.extract_strided_slice %503 {offsets = [0, 96], sizes = [8, 32], strides = [1, 1]} : vector<8x128xf32> to vector<8x32xf32>
    %519 = arith.negf %518 : vector<8x32xf32>
    %520 = math.exp %519 : vector<8x32xf32>
    %cst_102 = arith.constant 1.000000e+00 : f32
    %521 = vector.broadcast %cst_102 : f32 to vector<8x32xf32>
    %522 = arith.addf %521, %520 : vector<8x32xf32>
    %523 = arith.divf %521, %522 : vector<8x32xf32>
    %524 = arith.mulf %515, %496 : vector<8x32xf32>
    %525 = arith.mulf %509, %517 : vector<8x32xf32>
    %526 = arith.addf %524, %525 : vector<8x32xf32>
    %527 = math.tanh %526 : vector<8x32xf32>
    %528 = arith.mulf %523, %527 : vector<8x32xf32>
    %529 = arith.truncf %528 : vector<8x32xf32> to vector<8x32xbf16>
    %c0_103 = arith.constant 0 : index
    %c0_104 = arith.constant 0 : index
    %530 = vector.load %arg7[%c0_103, %c0_104] : memref<32x4xbf16, #tpu.memory_space<vmem>>, vector<32x4xbf16>
    %cst_105 = arith.constant dense<0.000000e+00> : vector<8x4xf32>
    %531 = tpu.matmul %529, %530, %cst_105 {dimension_numbers = #tpu.dot_dimension_numbers<[1], [0], [0], [1], [0, 0, 1, 1], [], []>} : vector<8x32xbf16>, vector<32x4xbf16>, vector<8x4xf32> -> vector<8x4xf32>
    %c0_106 = arith.constant 0 : index
    %c0_107 = arith.constant 0 : index
    %532 = vector.load %arg8[%c0_106, %c0_107] : memref<1x4xf32, #tpu.memory_space<vmem>>, vector<1x4xf32>
    %533 = vector.broadcast %532 : vector<1x4xf32> to vector<8x4xf32>
    %534 = arith.addf %531, %533 : vector<8x4xf32>
    %c0_108 = arith.constant 0 : index
    %c0_109 = arith.constant 0 : index
    %535 = vector.load %arg9[%c0_108, %c0_109] : memref<8x4xf32, #tpu.memory_space<vmem>>, vector<8x4xf32>
    tpu.vector_store %arg9[%c0_108, %c0_109], %534 {strides = array<i32>} : memref<8x4xf32, #tpu.memory_space<vmem>>, vector<8x4xf32>,
    return
  }
}

</mosaic_0001>

<bundles_post_ra>
// kernel: lstm_model_forward.1
= control target key start
LH: loop header
LB: loop body
LE: loop exit
PB: predicated region body
PF: predicated region fallthrough
CT: control target
= control target key end

     0   :  { %vm206_vm0 = vcmask 1043456   ;;  %v46_v0 = vlaneseq  ;;  %v2106_v1 = vmov 0.0   ;;  %v2107_v3 = vmov 1983009808   ;;  %s2111_s23 = smov 64   ;;  %s2556_s2 = inlined_call_operand.vmem [shape: bf16[32,128], index: 2, kind: input, shape index: {}]   ;;  %s2557_s1 = inlined_call_operand.vmem [shape: bf16[8,128], index: 1, kind: input, shape index: {}]   ;;  %s2558_s0 = inlined_call_operand.vmem [shape: f32[8,8,8], index: 0, kind: input, shape index: {}]   ;;  %s2559_s3 = inlined_call_operand.vmem [shape: f32[1,128], index: 3, kind: input, shape index: {}]   ;;  %s2560_s4 = inlined_call_operand.vmem [shape: bf16[32,128], index: 4, kind: input, shape index: {}]   ;;  %s2561_s5 = inlined_call_operand.vmem [shape: bf16[32,128], index: 5, kind: input, shape index: {}]   ;;  %s2562_s6 = inlined_call_operand.vmem [shape: f32[1,128], index: 6, kind: input, shape index: {}]   ;;  %s2563_s7 = inlined_call_operand.vmem [shape: bf16[32,4], index: 7, kind: input, shape index: {}]   ;;  %s2564_s8 = inlined_call_operand.vmem [shape: f32[1,4], index: 8, kind: input, shape index: {}]   ;;  %s2565_s9 = inlined_call_operand.vmem [shape: f32[8,4], index: 9, kind: output, shape index: {}]  }
   0x1   :  { %1802 = vmatprep.subr.bf16.mxu1 %v2106_v1  ;;  %v2167_v2 = vld [vmem:[%s2556_s2] sm:$0xff]   ;;  %v44_v4 = vunpack.c.l.s4 %v2107_v3  ;;  %v2176_v7 = vld [vmem:[%s2556_s2 + $0x8] sm:$0xff]   ;;  %v2108_v11 = vmov 1934713408   ;;  %vm2109_vm1 = vmmov 0   ;;  %v2110_v25 = vmov 0  }
   0x2   :  { %v177_v5 = vld [vmem:[%s2557_s1] sm:$0xf]  ;;  %1803 = vmatpush3.bf16.msra.mxu1 %v2167_v2  ;;  %v47_v9 = vshrl.u32 %v46_v0, 7  ;;  %v108_v12 = vunpack.c.l.s4 %v2108_v11  ;;  %1806 = vmatprep.mubr.msk.bf16.mxu1 %vm2109_vm1, %v2106_v1  ;;  %v1963_v14 = vld [vmem:[%s2558_s0 + $0x8] ss:$16 sps:$4 sm:$0xff]   ;;  %vm193_vm2 = vcmask 64512  }
   0x3   :  { %1950 = vmatprep.subr.msk.bf16.mxu0 %vm206_vm0, %v177_v5  ;;  %v208_v6 = vsel %vm206_vm0, %v177_v5, 0  ;;  %v45_v8 = vunpack.c.0.s8 %v44_v4  ;;  %1804 = vmatprep.subr.bf16.mxu1 %v2106_v1  ;;  %v1960_v13 = vld [vmem:[%s2558_s0] ss:$16 sps:$4 sm:$0xff]   ;;  %v1969_v19 = vld [vmem:[%s2558_s0 + $0x28] ss:$16 sps:$4 sm:$0xff]   ;;  %vm287_vm3 = vcmask 261120  }
   0x4   :  { %1793 = vmatpush3.bf16.msra.mxu0 %v208_v6  ;;  %v1966_v15 = vld [vmem:[%s2558_s0 + $0x20] ss:$16 sps:$4 sm:$0xff]   ;;  %v109_v16 = vunpack.c.0.s8 %v108_v12  ;;  %vm1674_vm4 = vcmask 31744  }
   0x5   :  { %v2179_v10 = vsub.s32 %v45_v8, %v47_v9  ;;  %1818 = vmatprep.subr.bf16.mxu0 %v2106_v1  ;;  %v2224_v42 = vld [vmem:[%s2559_s3] ss:$0 sm:$0xff]  ;;  %s2112_s3 = smov 32  }
   0x6   :  { %1805 = vmatpush3.bf16.msra.mxu1 %v2176_v7  ;;  %v2201_v21 = vsub.s32 %v109_v16, %v47_v9 }
   0x7   :  { %v49_v17 = vrot.slane %v1960_v13, %v2179_v10  ;;  %v65_v18 = vrot.slane %v1963_v14, %v2179_v10  ;;  %1810 = vmatprep.subr.bf16.mxu1 %v2106_v1  ;;  %v81_v20 = vrot.slane %v1966_v15, %v2179_v10  ;;  %v97_v22 = vrot.slane %v1969_v19, %v2179_v10 }
   0x9   :  { %v105_v23 = vcombine.low %v49_v17, %v65_v18  ;;  %v106_v24 = vcombine.high %v49_v17, %v65_v18  ;;  %1807 = vmatmul.mubr.bf16.vlgmr.msra.gmra.mrb[0].mxu1 %v2110_v25  ;;  %v137_v27 = vcombine.low %v81_v20, %v97_v22  ;;  %v138_v28 = vcombine.high %v81_v20, %v97_v22  ;;  %v1962_v18 = vld [vmem:[%s2558_s0 + $0x4] ss:$16 sps:$4 sm:$0xff]   ;;  %v1965_v20 = vld [vmem:[%s2558_s0 + $0xc] ss:$16 sps:$4 sm:$0xff]  }
   0xa   :  { %1811 = vmatpush3.bf16.msra.mxu1 %v2167_v2  ;;  %1814 = vmatprep.mubr.msk.bf16.mxu1 %vm2109_vm1, %v2106_v1  ;;  %v1968_v22 = vld [vmem:[%s2558_s0 + $0x24] ss:$16 sps:$4 sm:$0xff]  }
   0xb   :  { %v113_v26 = vrot.slane %v105_v23, %v2201_v21  ;;  %v120_v29 = vrot.slane %v106_v24, %v2201_v21  ;;  %1812 = vmatprep.subr.bf16.mxu1 %v2106_v1  ;;  %v145_v30 = vrot.slane %v137_v27, %v2201_v21  ;;  %v152_v31 = vrot.slane %v138_v28, %v2201_v21  ;;  %v1971_v23 = vld [vmem:[%s2558_s0 + $0x2c] ss:$16 sps:$4 sm:$0xff]  }
   0xc   :  { %v72_v27 = vrot.slane %v1965_v20, %v2179_v10  ;;  %v88_v28 = vrot.slane %v1968_v22, %v2179_v10 }
   0xd   :  { %v169_v32 = vcombine.low %v113_v26, %v145_v30  ;;  %v170_v33 = vcombine.high %v113_v26, %v145_v30  ;;  %v171_v34 = vcombine.low %v120_v29, %v152_v31  ;;  %v172_v35 = vcombine.high %v120_v29, %v152_v31 }
   0xe   :  { %1813 = vmatpush3.bf16.msra.mxu1 %v2176_v7  ;;  %v56_v26 = vrot.slane %v1962_v18, %v2179_v10  ;;  %v104_v29 = vrot.slane %v1971_v23, %v2179_v10 }
   0xf   :  { %1826 = vmatprep.subr.bf16.mxu1 %v2106_v1  ;;  %v183_v36 = vpack.c.bf16 %v170_v33, %v169_v32  ;;  %v184_v37 = vpack.c.bf16 %v172_v35, %v171_v34 }
  0x10   :  { %v121_v30 = vcombine.low %v56_v26, %v72_v27  ;;  %v153_v31 = vcombine.low %v88_v28, %v104_v29  ;;  %v122_v32 = vcombine.high %v56_v26, %v72_v27  ;;  %v154_v33 = vcombine.high %v88_v28, %v104_v29 }
  0x11   :  { %1794 = vmatprep.mubr.msk.bf16.mxu0 %vm193_vm2, %v183_v36 }
  0x12   :  { %1795 = vmatmul.mubr.msk.bf16.vlgmr.msra.gmra.mrb[0].mxu0 %vm193_vm2, %v184_v37  ;;  %v129_v34 = vrot.slane %v121_v30, %v2201_v21  ;;  %v161_v35 = vrot.slane %v153_v31, %v2201_v21  ;;  %v136_v36 = vrot.slane %v122_v32, %v2201_v21  ;;  %v168_v37 = vrot.slane %v154_v33, %v2201_v21 }
  0x13   :  { %1819 = vmatpush3.bf16.msra.mxu0 %v2167_v2 }
  0x14   :  { %1820 = vmatprep.subr.bf16.mxu0 %v2106_v1 }
  0x17   :  { %1821 = vmatpush3.bf16.msra.mxu0 %v2176_v7 }
  0x18   :  { %1834 = vmatprep.subr.bf16.mxu0 %v2106_v1 }
  0xdc   :  { %v325_v38 = vpop.f32.mrb[0].mxu1 }
  0xdd   :  { %v1808_v39 = vpop.f32.mrb[1].mxu1 }
  0xde   :  { %v328_v40 = vpop.f32.mrb[2].mxu1  ;;  %v174_v39 = vcombine.high %v129_v34, %v161_v35 }
  0xdf   :  { %v1809_v41 = vpop.f32.mrb[3].mxu1  ;;  %v175_v40 = vcombine.low %v136_v36, %v168_v37 }
  0xe0   :  { %v176_v41 = vcombine.high %v136_v36, %v168_v37 }
  0xe5   :  { %v2226_v43 = vpop.f32.mrb[0].mxu0 }
  0xe6   :  { %v244_v44 = vpop.f32.mrb[1].mxu0 }
  0xe7   :  { %v245_v45 = vadd.f32 %v2224_v42, %v244_v44  ;;  %v2229_v46 = vpop.f32.mrb[2].mxu0 }
  0xe8   :  { %v247_v47 = vpop.f32.mrb[3].mxu0 }
  0xe9   :  { %v331_v48 = vadd.f32 %v325_v38, %v245_v45  ;;  %v248_v0 = vadd.f32 %v2224_v42, %v247_v47  ;;  %v173_v38 = vcombine.low %v129_v34, %v161_v35  ;;  %v186_v47 = vpack.c.bf16 %v176_v41, %v175_v40 }
  0xeb   :  { %1978 = vtanh.f32 %v331_v48  ;;  %v1687_v50 = vmul.f32 -1.442695, %v331_v48  ;;  %v185_v45 = vpack.c.bf16 %v174_v39, %v173_v38 }
  0xed   :  { %1980 = vpow2.f32 %v1687_v50  ;;  %1798 = vmatprep.mubr.msk.bf16.mxu0 %vm193_vm2, %v185_v45 }
  0xee   :  { %1799 = vmatmul.mubr.msk.bf16.gmra.mrb[4].mxu0 %vm193_vm2, %v186_v47 }
  0xef   :  { %1822 = vmatprep.mubr.msk.bf16.mxu0 %vm2109_vm1, %v2106_v1 }
  0xf5   :  { %v1979_v49 = vpop.eup %1978 }
  0xf6   :  { %341 = vrot.lane.b32.xlu0 %v1979_v49, %s2111_s23 }
  0xf7   :  { %v1981_v51 = vpop.eup %1980 }
  0xf8   :  { %v335_v52 = vadd.f32 1.0, %v1981_v51 }
  0xfa   :  { %1982 = vrcp.f32 %v335_v52 }
 0x104   :  { %v1983_v53 = vpop.eup %1982 }
 0x105   :  { %v339_v56 = vmul.f32 0.0, %v1983_v53 }
 0x168   :  { %v342_v54 = vpop.permute.xlu0 %341 }
 0x169   :  { %v344_v55 = vmul.f32 %v1983_v53, %v342_v54  ;;  %v253_v54 = vadd.f32 %v2226_v43, %v2224_v42 }
 0x16b   :  { %346 = vrot.lane.b32.xlu0 %v344_v55, %s2112_s3 }
 0x1c1   :  { %v2279_v49 = vpop.f32.mrb[4].mxu0 }
 0x1c2   :  { %v2281_v50 = vpop.f32.mrb[5].mxu0 }
 0x1c3   :  { %v2283_v51 = vpop.f32.mrb[6].mxu0  ;;  %v261_v37 = vadd.f32 %v2224_v42, %v2281_v50 }
 0x1c4   :  { %v2285_v52 = vpop.f32.mrb[7].mxu0 }
 0x1dd   :  { %v347_v57 = vpop.permute.xlu0 %346 }
 0x1de   :  { %v349_v58 = vadd.f32 %v347_v57, %v339_v56 }
 0x1e0   :  { %1984 = vtanh.f32 %v349_v58 }
 0x1ea   :  { %v1985_v59 = vpop.eup %1984 }
 0x1eb   :  { %352 = vrot.lane.b32.xlu1 %v1985_v59, %s2111_s23 }
 0x25d   :  { %v353_v60 = vpop.permute.xlu1 %352 }
 0x25e   :  { %v2234_v61 = vmul.f32 %v1983_v53, %v353_v60 }
 0x260   :  { %v361_v62 = vpack.c.bf16 %v2234_v61, %v2234_v61 }
 0x262   :  { %363 = vrot.lane.b32.xlu1 %v361_v62, %s2112_s3 }
 0x2d4   :  { %v364_v63 = vpop.permute.xlu1 %363 }
 0x2d5   :  { %1815 = vmatmul.mubr.msk.bf16.vlgmr.msra.gmra.mrb[4].mxu1 %vm287_vm3, %v364_v63 }
 0x2d6   :  { %1827 = vmatpush3.bf16.msra.mxu1 %v2167_v2  ;;  %1830 = vmatprep.mubr.msk.bf16.mxu1 %vm2109_vm1, %v2106_v1 }
 0x2d7   :  { %1828 = vmatprep.subr.bf16.mxu1 %v2106_v1 }
 0x2da   :  { %1829 = vmatpush3.bf16.msra.mxu1 %v2176_v7 }
 0x2db   :  { %1842 = vmatprep.subr.bf16.mxu1 %v2106_v1 }
 0x3a8   :  { %v402_v3 = vpop.f32.mrb[4].mxu1 }
 0x3a9   :  { %v408_v4 = vadd.f32 %v402_v3, %v248_v0  ;;  %v1816_v5 = vpop.f32.mrb[5].mxu1 }
 0x3aa   :  { %v405_v6 = vpop.f32.mrb[6].mxu1 }
 0x3ab   :  { %1986 = vtanh.f32 %v408_v4  ;;  %v1817_v8 = vpop.f32.mrb[7].mxu1  ;;  %v1689_v11 = vmul.f32 -1.442695, %v408_v4 }
 0x3ad   :  { %1988 = vpow2.f32 %v1689_v11 }
 0x3b5   :  { %v1987_v9 = vpop.eup %1986 }
 0x3b6   :  { %418 = vrot.lane.b32.xlu0 %v1987_v9, %s2111_s23 }
 0x3b7   :  { %v1989_v12 = vpop.eup %1988 }
 0x3b8   :  { %v412_v13 = vadd.f32 1.0, %v1989_v12 }
 0x3ba   :  { %1990 = vrcp.f32 %v412_v13 }
 0x3c4   :  { %v1991_v14 = vpop.eup %1990 }
 0x3c5   :  { %v416_v17 = vmul.f32 %v1991_v14, %v349_v58 }
 0x428   :  { %v419_v15 = vpop.permute.xlu0 %418 }
 0x429   :  { %v421_v16 = vmul.f32 %v1991_v14, %v419_v15  ;;  %v256_v15 = vadd.f32 %v2229_v46, %v2224_v42 }
 0x42b   :  { %423 = vrot.lane.b32.xlu1 %v421_v16, %s2112_s3 }
 0x49d   :  { %v424_v19 = vpop.permute.xlu1 %423 }
 0x49e   :  { %v426_v24 = vadd.f32 %v424_v19, %v416_v17 }
 0x4a0   :  { %1992 = vtanh.f32 %v426_v24 }
 0x4aa   :  { %v1993_v44 = vpop.eup %1992 }
 0x4ab   :  { %429 = vrot.lane.b32.xlu0 %v1993_v44, %s2111_s23 }
 0x51d   :  { %v430_v10 = vpop.permute.xlu0 %429 }
 0x51e   :  { %v2274_v48 = vmul.f32 %v1991_v14, %v430_v10 }
 0x520   :  { %v439_v21 = vpack.c.bf16 %v2274_v48, %v2274_v48 }
 0x522   :  { %441 = vrot.lane.b32.xlu1 %v439_v21, %s2112_s3 }
 0x594   :  { %v442_v53 = vpop.permute.xlu1 %441 }
 0x595   :  { %1823 = vmatmul.mubr.msk.bf16.vlgmr.msra.gmra.mrb[8].mxu0 %vm287_vm3, %v442_v53 }
 0x596   :  { %1835 = vmatpush3.bf16.msra.mxu0 %v2167_v2  ;;  %1838 = vmatprep.mubr.msk.bf16.mxu0 %vm2109_vm1, %v2106_v1 }
 0x597   :  { %1836 = vmatprep.subr.bf16.mxu0 %v2106_v1 }
 0x59a   :  { %1837 = vmatpush3.bf16.msra.mxu0 %v2176_v7 }
 0x59b   :  { %1850 = vmatprep.subr.bf16.mxu0 %v2106_v1 }
 0x668   :  { %v480_v55 = vpop.f32.mrb[8].mxu0 }
 0x669   :  { %v486_v56 = vadd.f32 %v480_v55, %v253_v54  ;;  %v1824_v57 = vpop.f32.mrb[9].mxu0 }
 0x66a   :  { %v483_v58 = vpop.f32.mrb[10].mxu0 }
 0x66b   :  { %1994 = vtanh.f32 %v486_v56  ;;  %v1825_v59 = vpop.f32.mrb[11].mxu0  ;;  %v1691_v62 = vmul.f32 -1.442695, %v486_v56 }
 0x66d   :  { %1996 = vpow2.f32 %v1691_v62 }
 0x675   :  { %v1995_v60 = vpop.eup %1994 }
 0x676   :  { %496 = vrot.lane.b32.xlu0 %v1995_v60, %s2111_s23 }
 0x677   :  { %v1997_v63 = vpop.eup %1996 }
 0x678   :  { %v490_v0 = vadd.f32 1.0, %v1997_v63 }
 0x67a   :  { %1998 = vrcp.f32 %v490_v0  ;;  %v264_v0 = vadd.f32 %v2224_v42, %v2285_v52 }
 0x684   :  { %v1999_v3 = vpop.eup %1998 }
 0x685   :  { %v494_v43 = vmul.f32 %v1999_v3, %v426_v24 }
 0x6e8   :  { %v497_v4 = vpop.permute.xlu0 %496 }
 0x6e9   :  { %v499_v5 = vmul.f32 %v1999_v3, %v497_v4 }
 0x6eb   :  { %501 = vrot.lane.b32.xlu1 %v499_v5, %s2112_s3 }
 0x75d   :  { %v502_v6 = vpop.permute.xlu1 %501 }
 0x75e   :  { %v504_v8 = vadd.f32 %v502_v6, %v494_v43 }
 0x760   :  { %2000 = vtanh.f32 %v504_v8 }
 0x76a   :  { %v2001_v9 = vpop.eup %2000 }
 0x76b   :  { %507 = vrot.lane.b32.xlu0 %v2001_v9, %s2111_s23 }
 0x7dd   :  { %v508_v11 = vpop.permute.xlu0 %507 }
 0x7de   :  { %v2299_v12 = vmul.f32 %v1999_v3, %v508_v11 }
 0x7e0   :  { %v517_v13 = vpack.c.bf16 %v2299_v12, %v2299_v12 }
 0x7e2   :  { %519 = vrot.lane.b32.xlu1 %v517_v13, %s2112_s3 }
 0x854   :  { %v520_v14 = vpop.permute.xlu1 %519 }
 0x855   :  { %1831 = vmatmul.mubr.msk.bf16.vlgmr.msra.gmra.mrb[8].mxu1 %vm287_vm3, %v520_v14 }
 0x856   :  { %1843 = vmatpush3.bf16.msra.mxu1 %v2167_v2  ;;  %1846 = vmatprep.mubr.msk.bf16.mxu1 %vm2109_vm1, %v2106_v1 }
 0x857   :  { %1844 = vmatprep.subr.bf16.mxu1 %v2106_v1 }
 0x85a   :  { %1845 = vmatpush3.bf16.msra.mxu1 %v2176_v7 }
 0x85b   :  { %1858 = vmatprep.subr.bf16.mxu1 %v2106_v1 }
 0x928   :  { %v558_v16 = vpop.f32.mrb[8].mxu1 }
 0x929   :  { %v564_v17 = vadd.f32 %v558_v16, %v256_v15  ;;  %v1832_v18 = vpop.f32.mrb[9].mxu1 }
 0x92a   :  { %v561_v19 = vpop.f32.mrb[10].mxu1 }
 0x92b   :  { %2002 = vtanh.f32 %v564_v17  ;;  %v1833_v20 = vpop.f32.mrb[11].mxu1  ;;  %v1693_v23 = vmul.f32 -1.442695, %v564_v17 }
 0x92d   :  { %2004 = vpow2.f32 %v1693_v23  ;;  %v269_v23 = vadd.f32 %v2279_v49, %v2224_v42 }
 0x935   :  { %v2003_v22 = vpop.eup %2002 }
 0x936   :  { %574 = vrot.lane.b32.xlu0 %v2003_v22, %s2111_s23 }
 0x937   :  { %v2005_v24 = vpop.eup %2004 }
 0x938   :  { %v568_v26 = vadd.f32 1.0, %v2005_v24 }
 0x93a   :  { %2006 = vrcp.f32 %v568_v26 }
 0x944   :  { %v2007_v27 = vpop.eup %2006 }
 0x945   :  { %v572_v46 = vmul.f32 %v2007_v27, %v504_v8 }
 0x9a8   :  { %v575_v28 = vpop.permute.xlu0 %574 }
 0x9a9   :  { %v577_v29 = vmul.f32 %v2007_v27, %v575_v28 }
 0x9ab   :  { %579 = vrot.lane.b32.xlu1 %v577_v29, %s2112_s3 }
 0xa1d   :  { %v580_v30 = vpop.permute.xlu1 %579 }
 0xa1e   :  { %v582_v31 = vadd.f32 %v580_v30, %v572_v46 }
 0xa20   :  { %2008 = vtanh.f32 %v582_v31 }
 0xa2a   :  { %v2009_v32 = vpop.eup %2008 }
 0xa2b   :  { %585 = vrot.lane.b32.xlu0 %v2009_v32, %s2111_s23 }
 0xa9d   :  { %v586_v33 = vpop.permute.xlu0 %585 }
 0xa9e   :  { %v2316_v34 = vmul.f32 %v2007_v27, %v586_v33 }
 0xaa0   :  { %v595_v35 = vpack.c.bf16 %v2316_v34, %v2316_v34 }
 0xaa2   :  { %597 = vrot.lane.b32.xlu1 %v595_v35, %s2112_s3 }
 0xb14   :  { %v598_v36 = vpop.permute.xlu1 %597 }
 0xb15   :  { %1839 = vmatmul.mubr.msk.bf16.vlgmr.msra.gmra.mrb[12].mxu0 %vm287_vm3, %v598_v36 }
 0xb16   :  { %1851 = vmatpush3.bf16.msra.mxu0 %v2167_v2  ;;  %1854 = vmatprep.mubr.msk.bf16.mxu0 %vm2109_vm1, %v2106_v1 }
 0xb17   :  { %1852 = vmatprep.subr.bf16.mxu0 %v2106_v1 }
 0xb1a   :  { %1853 = vmatpush3.bf16.msra.mxu0 %v2176_v7 }
 0xbe8   :  { %v636_v38 = vpop.f32.mrb[12].mxu0 }
 0xbe9   :  { %v642_v39 = vadd.f32 %v636_v38, %v261_v37  ;;  %v1840_v40 = vpop.f32.mrb[13].mxu0 }
 0xbea   :  { %v639_v41 = vpop.f32.mrb[14].mxu0 }
 0xbeb   :  { %2010 = vtanh.f32 %v642_v39  ;;  %v1841_v44 = vpop.f32.mrb[15].mxu0  ;;  %v1695_v47 = vmul.f32 -1.442695, %v642_v39  ;;  %v1972_v41 = vld [vmem:[%s2560_s4] sm:$0xff]  }
 0xbec   :  { %1866 = vmatprep.subr.bf16.mxu0 %v1972_v41 }
 0xbed   :  { %2012 = vpow2.f32 %v1695_v47 }
 0xbf5   :  { %v2011_v45 = vpop.eup %2010 }
 0xbf6   :  { %652 = vrot.lane.b32.xlu0 %v2011_v45, %s2111_s23 }
 0xbf7   :  { %v2013_v10 = vpop.eup %2012 }
 0xbf8   :  { %v646_v21 = vadd.f32 1.0, %v2013_v10 }
 0xbfa   :  { %2014 = vrcp.f32 %v646_v21 }
 0xc04   :  { %v2015_v53 = vpop.eup %2014 }
 0xc05   :  { %v650_v50 = vmul.f32 %v2015_v53, %v582_v31 }
 0xc68   :  { %v653_v54 = vpop.permute.xlu0 %652 }
 0xc69   :  { %v655_v55 = vmul.f32 %v2015_v53, %v653_v54 }
 0xc6b   :  { %657 = vrot.lane.b32.xlu1 %v655_v55, %s2112_s3 }
 0xcdd   :  { %v658_v56 = vpop.permute.xlu1 %657 }
 0xcde   :  { %v660_v57 = vadd.f32 %v658_v56, %v650_v50  ;;  %v2391_v56 = vld [vmem:[%s2561_s5] sm:$0xff]  }
 0xce0   :  { %2016 = vtanh.f32 %v660_v57 }
 0xcea   :  { %v2017_v58 = vpop.eup %2016 }
 0xceb   :  { %663 = vrot.lane.b32.xlu0 %v2017_v58, %s2111_s23 }
 0xd5d   :  { %v664_v59 = vpop.permute.xlu0 %663 }
 0xd5e   :  { %v2332_v60 = vmul.f32 %v2015_v53, %v664_v59 }
 0xd60   :  { %v673_v62 = vpack.c.bf16 %v2332_v60, %v2332_v60 }
 0xd62   :  { %675 = vrot.lane.b32.xlu1 %v673_v62, %s2112_s3 }
 0xdd4   :  { %v676_v63 = vpop.permute.xlu1 %675 }
 0xdd5   :  { %1847 = vmatmul.mubr.msk.bf16.vlgmr.msra.gmra.mrb[12].mxu1 %vm287_vm3, %v676_v63 }
 0xdd6   :  { %1859 = vmatpush3.bf16.msra.mxu1 %v2167_v2  ;;  %1862 = vmatprep.mubr.msk.bf16.mxu1 %vm2109_vm1, %v2106_v1 }
 0xdd7   :  { %1860 = vmatprep.subr.bf16.mxu1 %v2106_v1 }
 0xdda   :  { %1861 = vmatpush3.bf16.msra.mxu1 %v2176_v7 }
 0xddb   :  { %1878 = vmatprep.subr.bf16.mxu1 %v2106_v1 }
 0xea8   :  { %v714_v3 = vpop.f32.mrb[12].mxu1 }
 0xea9   :  { %v720_v4 = vadd.f32 %v714_v3, %v264_v0  ;;  %v1848_v5 = vpop.f32.mrb[13].mxu1 }
 0xeaa   :  { %v717_v43 = vpop.f32.mrb[14].mxu1 }
 0xeab   :  { %2018 = vtanh.f32 %v720_v4  ;;  %v1849_v6 = vpop.f32.mrb[15].mxu1  ;;  %v1697_v2 = vmul.f32 -1.442695, %v720_v4 }
 0xead   :  { %2020 = vpow2.f32 %v1697_v2 }
 0xeb5   :  { %v2019_v8 = vpop.eup %2018 }
 0xeb6   :  { %730 = vrot.lane.b32.xlu0 %v2019_v8, %s2111_s23  ;;  %v2428_v8 = vld [vmem:[%s2562_s6] ss:$0 sm:$0xff] }
 0xeb7   :  { %v2021_v9 = vpop.eup %2020 }
 0xeb8   :  { %v724_v11 = vadd.f32 1.0, %v2021_v9 }
 0xeba   :  { %2022 = vrcp.f32 %v724_v11 }
 0xec4   :  { %v2023_v7 = vpop.eup %2022 }
 0xec5   :  { %v728_v52 = vmul.f32 %v2023_v7, %v660_v57  ;;  %v2399_v57 = vld [vmem:[%s2561_s5 + $0x8] sm:$0xff]  }
 0xf28   :  { %v731_v13 = vpop.permute.xlu0 %730 }
 0xf29   :  { %v733_v14 = vmul.f32 %v2023_v7, %v731_v13 }
 0xf2b   :  { %735 = vrot.lane.b32.xlu1 %v733_v14, %s2112_s3 }
 0xf9d   :  { %v736_v15 = vpop.permute.xlu1 %735 }
 0xf9e   :  { %v738_v16 = vadd.f32 %v736_v15, %v728_v52 }
 0xfa0   :  { %2024 = vtanh.f32 %v738_v16 }
 0xfaa   :  { %v2025_v17 = vpop.eup %2024 }
 0xfab   :  { %741 = vrot.lane.b32.xlu0 %v2025_v17, %s2111_s23 }
0x101d   :  { %v742_v18 = vpop.permute.xlu0 %741 }
0x101e   :  { %v2349_v19 = vmul.f32 %v2023_v7, %v742_v18 }
0x1020   :  { %v751_v20 = vpack.c.bf16 %v2349_v19, %v2349_v19 }
0x1022   :  { %753 = vrot.lane.b32.xlu1 %v751_v20, %s2112_s3 }
0x1094   :  { %v754_v22 = vpop.permute.xlu1 %753 }
0x1095   :  { %1855 = vmatmul.mubr.msk.bf16.vlgmr.msra.gmra.mrb[16].mxu0 %vm287_vm3, %v754_v22 }
0x1096   :  { %1867 = vmatpush3.bf16.msra.mxu0 %v1972_v41 }
0x1168   :  { %v792_v24 = vpop.f32.mrb[16].mxu0 }
0x1169   :  { %v798_v26 = vadd.f32 %v792_v24, %v269_v23  ;;  %v1856_v27 = vpop.f32.mrb[17].mxu0 }
0x116a   :  { %v795_v28 = vpop.f32.mrb[18].mxu0 }
0x116b   :  { %2026 = vtanh.f32 %v798_v26  ;;  %v1857_v29 = vpop.f32.mrb[19].mxu0  ;;  %v1699_v30 = vmul.f32 -1.442695, %v798_v26 }
0x116d   :  { %2028 = vpow2.f32 %v1699_v30 }
0x1175   :  { %v2027_v46 = vpop.eup %2026 }
0x1176   :  { %808 = vrot.lane.b32.xlu0 %v2027_v46, %s2111_s23 }
0x1177   :  { %v2029_v31 = vpop.eup %2028 }
0x1178   :  { %v802_v32 = vadd.f32 1.0, %v2029_v31 }
0x117a   :  { %2030 = vrcp.f32 %v802_v32 }
0x1184   :  { %v2031_v33 = vpop.eup %2030 }
0x1185   :  { %v806_v49 = vmul.f32 %v2031_v33, %v738_v16 }
0x11e8   :  { %v809_v35 = vpop.permute.xlu0 %808 }
0x11e9   :  { %v811_v36 = vmul.f32 %v2031_v33, %v809_v35 }
0x11eb   :  { %813 = vrot.lane.b32.xlu1 %v811_v36, %s2112_s3 }
0x11ef   :  { %357 = vrot.lane.b32.xlu1 %v2234_v61, %s2112_s3  ;;  %v1973_v61 = vld [vmem:[%s2560_s4 + $0x8] sm:$0xff]  }
0x11f0   :  { %1868 = vmatprep.subr.bf16.mxu0 %v1973_v61 }
0x11f1   :  { %1869 = vmatpush3.bf16.msra.mxu0 %v1973_v61 }
0x11f2   :  { %1894 = vmatprep.subr.bf16.mxu0 %v2106_v1 }
0x11f3   :  { %512 = vrot.lane.b32.xlu1 %v2299_v12, %s2112_s3 }
0x125d   :  { %v814_v37 = vpop.permute.xlu1 %813 }
0x125e   :  { %v2363_v38 = vadd.f32 %v814_v37, %v806_v49 }
0x1260   :  { %2032 = vtanh.f32 %v2363_v38 }
0x1261   :  { %v358_v39 = vpop.permute.xlu1 %357 }
0x1262   :  { %360 = vst.msk [vmem:[#allocation2] sm:$0xff] %vm287_vm3, %v358_v39 }
0x1265   :  { %v513_v40 = vpop.permute.xlu1 %512 }
0x1266   :  { %516 = vst.msk [vmem:[#allocation2 + $0x10] sm:$0xff] %vm287_vm3, %v513_v40 }
0x1269   :  { %v916_v53 = vld [vmem:[#allocation2] sm:$0xff] }
0x126a   :  { %v2033_v12 = vpop.eup %2032 }
0x126b   :  { %819 = vrot.lane.b32.xlu0 %v2033_v12, %s2111_s23 }
0x126f   :  { %434 = vrot.lane.b32.xlu0 %v2274_v48, %s2112_s3 }
0x1273   :  { %590 = vrot.lane.b32.xlu0 %v2316_v34, %s2112_s3  ;;  %v918_v34 = vld [vmem:[#allocation2 + $0x10] sm:$0xff] }
0x12dd   :  { %v820_v44 = vpop.permute.xlu0 %819 }
0x12de   :  { %v2380_v45 = vmul.f32 %v2031_v33, %v820_v44 }
0x12e0   :  { %v829_v47 = vpack.c.bf16 %v2380_v45, %v2380_v45 }
0x12e1   :  { %v435_v10 = vpop.permute.xlu0 %434 }
0x12e2   :  { %438 = vst.msk [vmem:[#allocation2 + $0x8] sm:$0xff] %vm287_vm3, %v435_v10  ;;  %831 = vrot.lane.b32.xlu1 %v829_v47, %s2112_s3 }
0x12e5   :  { %v591_v21 = vpop.permute.xlu0 %590 }
0x12e6   :  { %594 = vst.msk [vmem:[#allocation2 + $0x18] sm:$0xff] %vm287_vm3, %v591_v21 }
0x12e9   :  { %v917_v54 = vld [vmem:[#allocation2 + $0x8] sm:$0xff] }
0x12ea   :  { %v924_v48 = vpack.c.bf16 %v917_v54, %v916_v53 }
0x12ec   :  { %1870 = vmatprep.mubr.msk.bf16.mxu0 %vm287_vm3, %v924_v48 }
0x12ed   :  { %v919_v55 = vld [vmem:[#allocation2 + $0x18] sm:$0xff] }
0x12ee   :  { %v925_v50 = vpack.c.bf16 %v919_v55, %v918_v34 }
0x12f0   :  { %1871 = vmatmul.mubr.msk.bf16.vlgmr.msra.gmra.mrb[20].mxu0 %vm287_vm3, %v925_v50 }
0x12f1   :  { %1895 = vmatpush3.bf16.msra.mxu0 %v2391_v56 }
0x12f2   :  { %1896 = vmatprep.subr.bf16.mxu0 %v2106_v1 }
0x12f5   :  { %1897 = vmatpush3.bf16.msra.mxu0 %v2399_v57 }
0x12f6   :  { %1910 = vmatprep.subr.bf16.mxu0 %v2106_v1 }
0x1354   :  { %v832_v58 = vpop.permute.xlu1 %831 }
0x1355   :  { %1863 = vmatmul.mubr.msk.bf16.vlgmr.msra.gmra.mrb[16].mxu1 %vm287_vm3, %v832_v58 }
0x1356   :  { %1879 = vmatpush3.bf16.msra.mxu1 %v2391_v56  ;;  %1882 = vmatprep.mubr.msk.bf16.mxu1 %vm2109_vm1, %v2106_v1 }
0x1357   :  { %1880 = vmatprep.subr.bf16.mxu1 %v2106_v1 }
0x135a   :  { %1881 = vmatpush3.bf16.msra.mxu1 %v2399_v57 }
0x135b   :  { %1886 = vmatprep.subr.bf16.mxu1 %v2106_v1 }
0x135d   :  { %1883 = vmatmul.mubr.bf16.vlgmr.msra.gmra.mrb[20].mxu1 %v2110_v25  ;;  %v272_v25 = vadd.f32 %v2283_v51, %v2224_v42 }
0x135e   :  { %1887 = vmatpush3.bf16.msra.mxu1 %v2391_v56  ;;  %1890 = vmatprep.mubr.msk.bf16.mxu1 %vm2109_vm1, %v2106_v1 }
0x135f   :  { %1888 = vmatprep.subr.bf16.mxu1 %v2106_v1 }
0x1362   :  { %1889 = vmatpush3.bf16.msra.mxu1 %v2399_v57 }
0x1363   :  { %1902 = vmatprep.subr.bf16.mxu1 %v2106_v1 }
0x13c3   :  { %v2417_v59 = vpop.f32.mrb[20].mxu0 }
0x13c4   :  { %v992_v62 = vpop.f32.mrb[21].mxu0 }
0x13c5   :  { %v2419_v63 = vpop.f32.mrb[22].mxu0  ;;  %v993_v2 = vadd.f32 %v2428_v8, %v992_v62 }
0x13c6   :  { %v2421_v0 = vpop.f32.mrb[23].mxu0 }
0x13c7   :  { %v996_v12 = vadd.f32 %v2428_v8, %v2421_v0 }
0x1428   :  { %v870_v3 = vpop.f32.mrb[16].mxu1 }
0x1429   :  { %v876_v4 = vadd.f32 %v870_v3, %v272_v25  ;;  %v1864_v5 = vpop.f32.mrb[17].mxu1 }
0x142a   :  { %v873_v43 = vpop.f32.mrb[18].mxu1 }
0x142b   :  { %v1865_v6 = vpop.f32.mrb[19].mxu1  ;;  %v1701_v27 = vmul.f32 -1.442695, %v876_v4 }
0x1430   :  { %v1069_v9 = vpop.f32.mrb[20].mxu1 }
0x1431   :  { %v1075_v11 = vadd.f32 %v1069_v9, %v993_v2  ;;  %v1884_v7 = vpop.f32.mrb[21].mxu1 }
0x1432   :  { %v1072_v13 = vpop.f32.mrb[22].mxu1 }
0x1433   :  { %2034 = vtanh.f32 %v1075_v11  ;;  %v1885_v14 = vpop.f32.mrb[23].mxu1  ;;  %v1711_v42 = vmul.f32 -1.442695, %v1075_v11 }
0x1435   :  { %2036 = vpow2.f32 %v1711_v42 }
0x143d   :  { %v2035_v52 = vpop.eup %2034 }
0x143e   :  { %1085 = vrot.lane.b32.xlu0 %v2035_v52, %s2111_s23 }
0x143f   :  { %v2037_v51 = vpop.eup %2036 }
0x1440   :  { %v1079_v15 = vadd.f32 1.0, %v2037_v51 }
0x1442   :  { %2038 = vrcp.f32 %v1079_v15 }
0x144c   :  { %v2039_v16 = vpop.eup %2038 }
0x144d   :  { %v1083_v20 = vmul.f32 0.0, %v2039_v16 }
0x14b0   :  { %v1086_v17 = vpop.permute.xlu0 %1085 }
0x14b1   :  { %v1088_v18 = vmul.f32 %v2039_v16, %v1086_v17  ;;  %v1001_v17 = vadd.f32 %v2417_v59, %v2428_v8 }
0x14b3   :  { %1090 = vrot.lane.b32.xlu1 %v1088_v18, %s2112_s3 }
0x1525   :  { %v1091_v22 = vpop.permute.xlu1 %1090 }
0x1526   :  { %v1093_v23 = vadd.f32 %v1091_v22, %v1083_v20 }
0x1528   :  { %2040 = vtanh.f32 %v1093_v23 }
0x1529   :  { %2042 = vtanh.f32 %v876_v4 }
0x152a   :  { %2044 = vpow2.f32 %v1701_v27 }
0x1532   :  { %v2041_v24 = vpop.eup %2040 }
0x1533   :  { %1096 = vrot.lane.b32.xlu0 %v2041_v24, %s2111_s23  ;;  %v2043_v26 = vpop.eup %2042 }
0x1534   :  { %v2045_v28 = vpop.eup %2044 }
0x1535   :  { %v880_v29 = vadd.f32 1.0, %v2045_v28 }
0x1537   :  { %886 = vrot.lane.b32.xlu0 %v2043_v26, %s2111_s23  ;;  %2046 = vrcp.f32 %v880_v29 }
0x1541   :  { %v2047_v32 = vpop.eup %2046 }
0x1542   :  { %v884_v49 = vmul.f32 %v2047_v32, %v2363_v38 }
0x15a5   :  { %v1097_v46 = vpop.permute.xlu0 %1096 }
0x15a6   :  { %v1099_v30 = vmul.f32 %v2039_v16, %v1097_v46 }
0x15a8   :  { %v1100_v31 = vpack.c.bf16 %v1099_v30, %v1099_v30 }
0x15a9   :  { %v887_v33 = vpop.permute.xlu0 %886 }
0x15aa   :  { %v889_v35 = vmul.f32 %v2047_v32, %v887_v33  ;;  %1102 = vrot.lane.b32.xlu1 %v1100_v31, %s2112_s3 }
0x15ac   :  { %891 = vrot.lane.b32.xlu0 %v889_v35, %s2112_s3 }
0x161c   :  { %v1103_v36 = vpop.permute.xlu1 %1102 }
0x161d   :  { %1891 = vmatmul.mubr.msk.bf16.vlgmr.msra.gmra.mrb[24].mxu1 %vm287_vm3, %v1103_v36 }
0x161e   :  { %v892_v37 = vpop.permute.xlu0 %891  ;;  %1903 = vmatpush3.bf16.msra.mxu1 %v2391_v56  ;;  %1906 = vmatprep.mubr.msk.bf16.mxu1 %vm2109_vm1, %v2106_v1 }
0x161f   :  { %v894_v39 = vadd.f32 %v892_v37, %v884_v49  ;;  %1904 = vmatprep.subr.bf16.mxu1 %v2106_v1 }
0x1621   :  { %2048 = vtanh.f32 %v894_v39 }
0x1622   :  { %1905 = vmatpush3.bf16.msra.mxu1 %v2399_v57 }
0x1623   :  { %1918 = vmatprep.subr.bf16.mxu1 %v2106_v1 }
0x162b   :  { %v2049_v40 = vpop.eup %2048 }
0x162c   :  { %897 = vrot.lane.b32.xlu0 %v2049_v40, %s2111_s23  ;;  %v1004_v40 = vadd.f32 %v2419_v63, %v2428_v8 }
0x1630   :  { %668 = vrot.lane.b32.xlu0 %v2332_v60, %s2112_s3 }
0x1634   :  { %824 = vrot.lane.b32.xlu0 %v2380_v45, %s2112_s3 }
0x169e   :  { %v898_v38 = vpop.permute.xlu0 %897 }
0x169f   :  { %v900_v3 = vmul.f32 %v2047_v32, %v898_v38 }
0x16a2   :  { %v669_v41 = vpop.permute.xlu0 %668 }
0x16a3   :  { %672 = vst.msk [vmem:[#allocation2 + $0x20] sm:$0xff] %vm287_vm3, %v669_v41 }
0x16a6   :  { %v825_v61 = vpop.permute.xlu0 %824 }
0x16a7   :  { %828 = vst.msk [vmem:[#allocation2 + $0x30] sm:$0xff] %vm287_vm3, %v825_v61 }
0x16aa   :  { %v920_v9 = vld [vmem:[#allocation2 + $0x20] sm:$0xff] }
0x16f0   :  { %v1141_v44 = vpop.f32.mrb[24].mxu1 }
0x16f1   :  { %v1147_v47 = vadd.f32 %v1141_v44, %v996_v12  ;;  %v1892_v10 = vpop.f32.mrb[25].mxu1 }
0x16f2   :  { %v1144_v21 = vpop.f32.mrb[26].mxu1 }
0x16f3   :  { %2050 = vtanh.f32 %v1147_v47  ;;  %v1893_v53 = vpop.f32.mrb[27].mxu1  ;;  %v1713_v45 = vmul.f32 -1.442695, %v1147_v47 }
0x16f5   :  { %2052 = vpow2.f32 %v1713_v45 }
0x16fd   :  { %v2051_v60 = vpop.eup %2050 }
0x16fe   :  { %1157 = vrot.lane.b32.xlu1 %v2051_v60, %s2111_s23 }
0x16ff   :  { %v2053_v54 = vpop.eup %2052 }
0x1700   :  { %v1151_v48 = vadd.f32 1.0, %v2053_v54 }
0x1702   :  { %2054 = vrcp.f32 %v1151_v48 }
0x170c   :  { %v2055_v34 = vpop.eup %2054 }
0x170d   :  { %v1155_v58 = vmul.f32 %v2055_v34, %v1093_v23 }
0x1770   :  { %v1158_v55 = vpop.permute.xlu1 %1157 }
0x1771   :  { %v1160_v50 = vmul.f32 %v2055_v34, %v1158_v55 }
0x1773   :  { %1162 = vrot.lane.b32.xlu1 %v1160_v50, %s2112_s3 }
0x17e5   :  { %v1163_v62 = vpop.permute.xlu1 %1162 }
0x17e6   :  { %v1165_v0 = vadd.f32 %v1163_v62, %v1155_v58 }
0x17e8   :  { %2056 = vtanh.f32 %v1165_v0 }
0x17f2   :  { %v2057_v25 = vpop.eup %2056 }
0x17f3   :  { %1168 = vrot.lane.b32.xlu1 %v2057_v25, %s2111_s23 }
0x17f7   :  { %746 = vrot.lane.b32.xlu1 %v2349_v19, %s2112_s3  ;;  %v922_v19 = vld [vmem:[#allocation2 + $0x30] sm:$0xff] }
0x17fb   :  { %902 = vrot.lane.b32.xlu1 %v900_v3, %s2112_s3 }
0x1865   :  { %v1169_v4 = vpop.permute.xlu1 %1168 }
0x1866   :  { %v1171_v5 = vmul.f32 %v2055_v34, %v1169_v4 }
0x1868   :  { %v1172_v43 = vpack.c.bf16 %v1171_v5, %v1171_v5 }
0x1869   :  { %v747_v6 = vpop.permute.xlu1 %746 }
0x186a   :  { %750 = vst.msk [vmem:[#allocation2 + $0x28] sm:$0xff] %vm287_vm3, %v747_v6  ;;  %1174 = vrot.lane.b32.xlu0 %v1172_v43, %s2112_s3 }
0x186d   :  { %v903_v2 = vpop.permute.xlu1 %902 }
0x186e   :  { %906 = vst.msk [vmem:[#allocation2 + $0x38] sm:$0xff] %vm287_vm3, %v903_v2 }
0x1871   :  { %v921_v11 = vld [vmem:[#allocation2 + $0x28] sm:$0xff] }
0x1872   :  { %v926_v7 = vpack.c.bf16 %v921_v11, %v920_v9 }
0x1874   :  { %1874 = vmatprep.mubr.msk.bf16.mxu0 %vm287_vm3, %v926_v7 }
0x1875   :  { %v923_v13 = vld [vmem:[#allocation2 + $0x38] sm:$0xff] }
0x1876   :  { %v927_v14 = vpack.c.bf16 %v923_v13, %v922_v19 }
0x1878   :  { %1875 = vmatmul.mubr.msk.bf16.gmra.mrb[24].mxu0 %vm287_vm3, %v927_v14 }
0x1879   :  { %1898 = vmatprep.mubr.msk.bf16.mxu0 %vm2109_vm1, %v2106_v1 }
0x18dc   :  { %v1175_v52 = vpop.permute.xlu0 %1174 }
0x18dd   :  { %1899 = vmatmul.mubr.msk.bf16.vlgmr.msra.gmra.mrb[28].mxu0 %vm287_vm3, %v1175_v52 }
0x18de   :  { %1911 = vmatpush3.bf16.msra.mxu0 %v2391_v56  ;;  %1914 = vmatprep.mubr.msk.bf16.mxu0 %vm2109_vm1, %v2106_v1 }
0x18df   :  { %1912 = vmatprep.subr.bf16.mxu0 %v2106_v1 }
0x18e2   :  { %1913 = vmatpush3.bf16.msra.mxu0 %v2399_v57 }
0x18e3   :  { %1926 = vmatprep.subr.bf16.mxu0 %v2106_v1 }
0x194b   :  { %v2474_v42 = vpop.f32.mrb[24].mxu0 }
0x194c   :  { %v2476_v51 = vpop.f32.mrb[25].mxu0 }
0x194d   :  { %v2478_v15 = vpop.f32.mrb[26].mxu0  ;;  %v1009_v25 = vadd.f32 %v2428_v8, %v2476_v51 }
0x194e   :  { %v2480_v16 = vpop.f32.mrb[27].mxu0 }
0x19b0   :  { %v1213_v18 = vpop.f32.mrb[28].mxu0 }
0x19b1   :  { %v1219_v20 = vadd.f32 %v1213_v18, %v1001_v17  ;;  %v1900_v22 = vpop.f32.mrb[29].mxu0 }
0x19b2   :  { %v1216_v23 = vpop.f32.mrb[30].mxu0 }
0x19b3   :  { %2058 = vtanh.f32 %v1219_v20  ;;  %v1901_v24 = vpop.f32.mrb[31].mxu0  ;;  %v1715_v27 = vmul.f32 -1.442695, %v1219_v20 }
0x19b5   :  { %2060 = vpow2.f32 %v1715_v27 }
0x19bd   :  { %v2059_v26 = vpop.eup %2058 }
0x19be   :  { %1229 = vrot.lane.b32.xlu1 %v2059_v26, %s2111_s23  ;;  %v1012_v26 = vadd.f32 %v2428_v8, %v2480_v16 }
0x19bf   :  { %v2061_v28 = vpop.eup %2060 }
0x19c0   :  { %v1223_v29 = vadd.f32 1.0, %v2061_v28 }
0x19c2   :  { %2062 = vrcp.f32 %v1223_v29 }
0x19cc   :  { %v2063_v46 = vpop.eup %2062 }
0x19cd   :  { %v1227_v59 = vmul.f32 %v2063_v46, %v1165_v0 }
0x1a30   :  { %v1230_v30 = vpop.permute.xlu1 %1229 }
0x1a31   :  { %v1232_v31 = vmul.f32 %v2063_v46, %v1230_v30 }
0x1a33   :  { %1234 = vrot.lane.b32.xlu0 %v1232_v31, %s2112_s3 }
0x1aa5   :  { %v1235_v32 = vpop.permute.xlu0 %1234 }
0x1aa6   :  { %v1237_v33 = vadd.f32 %v1235_v32, %v1227_v59 }
0x1aa8   :  { %2064 = vtanh.f32 %v1237_v33 }
0x1ab2   :  { %v2065_v35 = vpop.eup %2064 }
0x1ab3   :  { %1240 = vrot.lane.b32.xlu1 %v2065_v35, %s2111_s23 }
0x1b25   :  { %v1241_v36 = vpop.permute.xlu1 %1240 }
0x1b26   :  { %v1243_v49 = vmul.f32 %v2063_v46, %v1241_v36 }
0x1b28   :  { %v1244_v37 = vpack.c.bf16 %v1243_v49, %v1243_v49 }
0x1b2a   :  { %1246 = vrot.lane.b32.xlu0 %v1244_v37, %s2112_s3 }
0x1b9c   :  { %v1247_v39 = vpop.permute.xlu0 %1246 }
0x1b9d   :  { %1907 = vmatmul.mubr.msk.bf16.vlgmr.msra.gmra.mrb[28].mxu1 %vm287_vm3, %v1247_v39 }
0x1b9e   :  { %1919 = vmatpush3.bf16.msra.mxu1 %v2391_v56  ;;  %1922 = vmatprep.mubr.msk.bf16.mxu1 %vm2109_vm1, %v2106_v1 }
0x1b9f   :  { %1920 = vmatprep.subr.bf16.mxu1 %v2106_v1 }
0x1ba2   :  { %1921 = vmatpush3.bf16.msra.mxu1 %v2399_v57 }
0x1ba3   :  { %1934 = vmatprep.subr.bf16.mxu1 %v2106_v1 }
0x1c70   :  { %v1285_v38 = vpop.f32.mrb[28].mxu1 }
0x1c71   :  { %v1291_v41 = vadd.f32 %v1285_v38, %v1004_v40  ;;  %v1908_v61 = vpop.f32.mrb[29].mxu1 }
0x1c72   :  { %v1288_v12 = vpop.f32.mrb[30].mxu1  ;;  %v1017_v61 = vadd.f32 %v2474_v42, %v2428_v8 }
0x1c73   :  { %2066 = vtanh.f32 %v1291_v41  ;;  %v1909_v44 = vpop.f32.mrb[31].mxu1  ;;  %v1717_v10 = vmul.f32 -1.442695, %v1291_v41 }
0x1c75   :  { %2068 = vpow2.f32 %v1717_v10 }
0x1c7d   :  { %v2067_v47 = vpop.eup %2066 }
0x1c7e   :  { %1301 = vrot.lane.b32.xlu1 %v2067_v47, %s2111_s23 }
0x1c7f   :  { %v2069_v21 = vpop.eup %2068 }
0x1c80   :  { %v1295_v53 = vadd.f32 1.0, %v2069_v21 }
0x1c82   :  { %2070 = vrcp.f32 %v1295_v53 }
0x1c8c   :  { %v2071_v60 = vpop.eup %2070 }
0x1c8d   :  { %v1299_v63 = vmul.f32 %v2071_v60, %v1237_v33 }
0x1cf0   :  { %v1302_v45 = vpop.permute.xlu1 %1301 }
0x1cf1   :  { %v1304_v54 = vmul.f32 %v2071_v60, %v1302_v45 }
0x1cf3   :  { %1306 = vrot.lane.b32.xlu0 %v1304_v54, %s2112_s3 }
0x1d65   :  { %v1307_v48 = vpop.permute.xlu0 %1306 }
0x1d66   :  { %v1309_v34 = vadd.f32 %v1307_v48, %v1299_v63 }
0x1d68   :  { %2072 = vtanh.f32 %v1309_v34 }
0x1d72   :  { %v2073_v55 = vpop.eup %2072 }
0x1d73   :  { %1312 = vrot.lane.b32.xlu1 %v2073_v55, %s2111_s23 }
0x1de5   :  { %v1313_v50 = vpop.permute.xlu1 %1312 }
0x1de6   :  { %v1315_v58 = vmul.f32 %v2071_v60, %v1313_v50 }
0x1de8   :  { %v1316_v62 = vpack.c.bf16 %v1315_v58, %v1315_v58 }
0x1dea   :  { %1318 = vrot.lane.b32.xlu0 %v1316_v62, %s2112_s3 }
0x1e5c   :  { %v1319_v0 = vpop.permute.xlu0 %1318 }
0x1e5d   :  { %1915 = vmatmul.mubr.msk.bf16.vlgmr.msra.gmra.mrb[32].mxu0 %vm287_vm3, %v1319_v0 }
0x1e5e   :  { %1927 = vmatpush3.bf16.msra.mxu0 %v2391_v56  ;;  %1930 = vmatprep.mubr.msk.bf16.mxu0 %vm2109_vm1, %v2106_v1 }
0x1e5f   :  { %1928 = vmatprep.subr.bf16.mxu0 %v2106_v1 }
0x1e62   :  { %1929 = vmatpush3.bf16.msra.mxu0 %v2399_v57 }
0x1e63   :  { %1942 = vmatprep.subr.bf16.mxu0 %v2106_v1 }
0x1f30   :  { %v1357_v3 = vpop.f32.mrb[32].mxu0 }
0x1f31   :  { %v1363_v4 = vadd.f32 %v1357_v3, %v1009_v25  ;;  %v1916_v5 = vpop.f32.mrb[33].mxu0 }
0x1f32   :  { %v1360_v43 = vpop.f32.mrb[34].mxu0 }
0x1f33   :  { %2074 = vtanh.f32 %v1363_v4  ;;  %v1917_v6 = vpop.f32.mrb[35].mxu0  ;;  %v1719_v9 = vmul.f32 -1.442695, %v1363_v4  ;;  %v1020_v4 = vadd.f32 %v2478_v15, %v2428_v8 }
0x1f35   :  { %2076 = vpow2.f32 %v1719_v9 }
0x1f3d   :  { %v2075_v2 = vpop.eup %2074 }
0x1f3e   :  { %1373 = vrot.lane.b32.xlu1 %v2075_v2, %s2111_s23 }
0x1f3f   :  { %v2077_v11 = vpop.eup %2076 }
0x1f40   :  { %v1367_v7 = vadd.f32 1.0, %v2077_v11 }
0x1f42   :  { %2078 = vrcp.f32 %v1367_v7 }
0x1f4c   :  { %v2079_v19 = vpop.eup %2078 }
0x1f4d   :  { %v1371_v52 = vmul.f32 %v2079_v19, %v1309_v34 }
0x1fb0   :  { %v1374_v13 = vpop.permute.xlu1 %1373 }
0x1fb1   :  { %v1376_v14 = vmul.f32 %v2079_v19, %v1374_v13 }
0x1fb3   :  { %1378 = vrot.lane.b32.xlu0 %v1376_v14, %s2112_s3 }
0x2025   :  { %v1379_v51 = vpop.permute.xlu0 %1378 }
0x2026   :  { %v1381_v17 = vadd.f32 %v1379_v51, %v1371_v52 }
0x2028   :  { %2080 = vtanh.f32 %v1381_v17 }
0x2032   :  { %v2081_v18 = vpop.eup %2080 }
0x2033   :  { %1384 = vrot.lane.b32.xlu1 %v2081_v18, %s2111_s23  ;;  %v1976_v18 = vld [vmem:[%s2563_s7] sm:$0xff]  }
0x20a5   :  { %v1385_v20 = vpop.permute.xlu1 %1384 }
0x20a6   :  { %v1387_v22 = vmul.f32 %v2079_v19, %v1385_v20  ;;  %v1977_v20 = vld [vmem:[%s2563_s7 + $0x8] sm:$0xff]  }
0x20a8   :  { %v1388_v23 = vpack.c.bf16 %v1387_v22, %v1387_v22 }
0x20aa   :  { %1390 = vrot.lane.b32.xlu0 %v1388_v23, %s2112_s3 }
0x211c   :  { %v1391_v24 = vpop.permute.xlu0 %1390 }
0x211d   :  { %1923 = vmatmul.mubr.msk.bf16.vlgmr.msra.gmra.mrb[32].mxu1 %vm287_vm3, %v1391_v24 }
0x211e   :  { %1935 = vmatpush3.bf16.msra.mxu1 %v2391_v56  ;;  %1938 = vmatprep.mubr.msk.bf16.mxu1 %vm2109_vm1, %v2106_v1 }
0x211f   :  { %1936 = vmatprep.subr.bf16.mxu1 %v2106_v1 }
0x2122   :  { %1937 = vmatpush3.bf16.msra.mxu1 %v2399_v57 }
0x21f0   :  { %v1429_v27 = vpop.f32.mrb[32].mxu1 }
0x21f1   :  { %v1435_v28 = vadd.f32 %v1429_v27, %v1012_v26  ;;  %v1924_v29 = vpop.f32.mrb[33].mxu1 }
0x21f2   :  { %v1432_v46 = vpop.f32.mrb[34].mxu1 }
0x21f3   :  { %2082 = vtanh.f32 %v1435_v28  ;;  %v1925_v30 = vpop.f32.mrb[35].mxu1  ;;  %v1721_v56 = vmul.f32 -1.442695, %v1435_v28  ;;  %v1726_v28 = vld [vmem:[%s2564_s8] ss:$0 sm:$0xff] }
0x21f5   :  { %2084 = vpow2.f32 %v1721_v56 }
0x21fd   :  { %v2083_v31 = vpop.eup %2082 }
0x21fe   :  { %1445 = vrot.lane.b32.xlu1 %v2083_v31, %s2111_s23 }
0x21ff   :  { %v2085_v59 = vpop.eup %2084 }
0x2200   :  { %v1439_v32 = vadd.f32 1.0, %v2085_v59 }
0x2202   :  { %2086 = vrcp.f32 %v1439_v32 }
0x220c   :  { %v2087_v33 = vpop.eup %2086 }
0x220d   :  { %v1443_v16 = vmul.f32 %v2087_v33, %v1381_v17 }
0x2270   :  { %v1446_v35 = vpop.permute.xlu1 %1445 }
0x2271   :  { %v1448_v57 = vmul.f32 %v2087_v33, %v1446_v35 }
0x2273   :  { %1450 = vrot.lane.b32.xlu0 %v1448_v57, %s2112_s3 }
0x22e5   :  { %v1451_v36 = vpop.permute.xlu0 %1450 }
0x22e6   :  { %v1453_v49 = vadd.f32 %v1451_v36, %v1443_v16 }
0x22e8   :  { %2088 = vtanh.f32 %v1453_v49 }
0x22f2   :  { %v2089_v37 = vpop.eup %2088 }
0x22f3   :  { %1456 = vrot.lane.b32.xlu1 %v2089_v37, %s2111_s23 }
0x2365   :  { %v1457_v39 = vpop.permute.xlu1 %1456 }
0x2366   :  { %v1459_v40 = vmul.f32 %v2087_v33, %v1457_v39 }
0x2368   :  { %v1460_v38 = vpack.c.bf16 %v1459_v40, %v1459_v40 }
0x236a   :  { %1462 = vrot.lane.b32.xlu0 %v1460_v38, %s2112_s3 }
0x23dc   :  { %v1463_v41 = vpop.permute.xlu0 %1462 }
0x23dd   :  { %1931 = vmatmul.mubr.msk.bf16.vlgmr.msra.gmra.mrb[36].mxu0 %vm287_vm3, %v1463_v41 }
0x23de   :  { %1946 = vmatprep.mubr.msk.bf16.mxu0 %vm2109_vm1, %v2106_v1  ;;  %1943 = vmatpush3.bf16.msra.mxu0 %v1976_v18 }
0x23df   :  { %1944 = vmatprep.subr.bf16.mxu0 %v2106_v1 }
0x23e2   :  { %1945 = vmatpush3.bf16.msra.mxu0 %v1977_v20 }
0x24b0   :  { %v1501_v12 = vpop.f32.mrb[36].mxu0 }
0x24b1   :  { %v1507_v44 = vadd.f32 %v1501_v12, %v1017_v61  ;;  %v1932_v47 = vpop.f32.mrb[37].mxu0 }
0x24b2   :  { %v1504_v10 = vpop.f32.mrb[38].mxu0 }
0x24b3   :  { %2090 = vtanh.f32 %v1507_v44  ;;  %v1933_v21 = vpop.f32.mrb[39].mxu0  ;;  %v1723_v60 = vmul.f32 -1.442695, %v1507_v44 }
0x24b5   :  { %2092 = vpow2.f32 %v1723_v60 }
0x24bd   :  { %v2091_v53 = vpop.eup %2090 }
0x24be   :  { %1517 = vrot.lane.b32.xlu1 %v2091_v53, %s2111_s23 }
0x24bf   :  { %v2093_v45 = vpop.eup %2092 }
0x24c0   :  { %v1511_v54 = vadd.f32 1.0, %v2093_v45 }
0x24c2   :  { %2094 = vrcp.f32 %v1511_v54 }
0x24cc   :  { %v2095_v63 = vpop.eup %2094 }
0x24cd   :  { %v1515_v42 = vmul.f32 %v2095_v63, %v1453_v49 }
0x2530   :  { %v1518_v48 = vpop.permute.xlu1 %1517 }
0x2531   :  { %v1520_v34 = vmul.f32 %v2095_v63, %v1518_v48 }
0x2533   :  { %1522 = vrot.lane.b32.xlu0 %v1520_v34, %s2112_s3 }
0x25a5   :  { %v1523_v55 = vpop.permute.xlu0 %1522 }
0x25a6   :  { %v1525_v50 = vadd.f32 %v1523_v55, %v1515_v42 }
0x25a8   :  { %2096 = vtanh.f32 %v1525_v50 }
0x25b2   :  { %v2097_v58 = vpop.eup %2096 }
0x25b3   :  { %1528 = vrot.lane.b32.xlu1 %v2097_v58, %s2111_s23 }
0x2625   :  { %v1529_v62 = vpop.permute.xlu1 %1528 }
0x2626   :  { %v1531_v0 = vmul.f32 %v2095_v63, %v1529_v62 }
0x2628   :  { %v1532_v25 = vpack.c.bf16 %v1531_v0, %v1531_v0 }
0x262a   :  { %1534 = vrot.lane.b32.xlu0 %v1532_v25, %s2112_s3 }
0x269c   :  { %v1535_v3 = vpop.permute.xlu0 %1534 }
0x269d   :  { %1939 = vmatmul.mubr.msk.bf16.vlgmr.msra.gmra.mrb[36].mxu1 %vm287_vm3, %v1535_v3 }
0x2770   :  { %v1573_v5 = vpop.f32.mrb[36].mxu1 }
0x2771   :  { %v1579_v43 = vadd.f32 %v1573_v5, %v1020_v4  ;;  %v1940_v6 = vpop.f32.mrb[37].mxu1 }
0x2772   :  { %v1576_v2 = vpop.f32.mrb[38].mxu1 }
0x2773   :  { %2098 = vtanh.f32 %v1579_v43  ;;  %v1941_v9 = vpop.f32.mrb[39].mxu1  ;;  %v1725_v7 = vmul.f32 -1.442695, %v1579_v43 }
0x2775   :  { %2100 = vpow2.f32 %v1725_v7 }
0x277d   :  { %v2099_v11 = vpop.eup %2098 }
0x277e   :  { %1589 = vrot.lane.b32.xlu1 %v2099_v11, %s2111_s23 }
0x277f   :  { %v2101_v19 = vpop.eup %2100 }
0x2780   :  { %v1583_v13 = vadd.f32 1.0, %v2101_v19 }
0x2782   :  { %2102 = vrcp.f32 %v1583_v13 }
0x278c   :  { %v2103_v14 = vpop.eup %2102 }
0x278d   :  { %v1587_v8 = vmul.f32 %v2103_v14, %v1525_v50 }
0x27f0   :  { %v1590_v52 = vpop.permute.xlu1 %1589 }
0x27f1   :  { %v1592_v51 = vmul.f32 %v2103_v14, %v1590_v52 }
0x27f3   :  { %1594 = vrot.lane.b32.xlu0 %v1592_v51, %s2112_s3 }
0x2865   :  { %v1595_v15 = vpop.permute.xlu0 %1594 }
0x2866   :  { %v1597_v17 = vadd.f32 %v1595_v15, %v1587_v8 }
0x2868   :  { %2104 = vtanh.f32 %v1597_v17 }
0x2872   :  { %v2105_v22 = vpop.eup %2104 }
0x2873   :  { %1600 = vrot.lane.b32.xlu1 %v2105_v22, %s2111_s23 }
0x28e5   :  { %v1601_v23 = vpop.permute.xlu1 %1600 }
0x28e6   :  { %v1603_v24 = vmul.f32 %v2103_v14, %v1601_v23 }
0x28e8   :  { %v1604_v26 = vpack.c.bf16 %v1603_v24, %v1603_v24 }
0x28ea   :  { %1617 = vrot.lane.b32.xlu0 %v1604_v26, %s2112_s3 }
0x295c   :  { %v1618_v27 = vpop.permute.xlu0 %1617 }
0x295d   :  { %1947 = vmatmul.mubr.msk.bf16.vlgmr.msra.gmra.mrb[40].mxu0 %vm287_vm3, %v1618_v27 }
0x2a30   :  { %v1668_v29 = vpop.f32.mrb[40].mxu0 }
0x2a31   :  { %v1669_v46 = vadd.f32 %v1726_v28, %v1668_v29  ;;  %v1948_v1 = vpop.f32.mrb[41].mxu0 }
0x2a32   :  { %v1671_v30 = vpop.f32.mrb[42].mxu0 }
0x2a33   :  { %1675 = vst.msk [vmem:[%s2565_s9] sm:$0xff] %vm1674_vm4, %v1669_v46  ;;  %v1949_v31 = vpop.f32.mrb[43].mxu0 }

</bundles_post_ra>
